<compile_context>
chip_gen: v6e
topology: v6e:2x2x1
jax: 0.10.0
libtpu: 0.0.40
codegen_flags: <defaults>
</compile_context>

<pallas_src>
import functools

import jax
import jax.numpy as jnp
import numpy as np
from jax.experimental import pallas as pl
from jax.experimental.pallas import tpu as pltpu


# ---------------------------------------------------------------------------
# Kernel 1: one GCNConv layer.  out = ReLU((A @ X) @ W + b)
# grid = (N//TM, N//TK); K axis is the reduction over columns of A.
# ---------------------------------------------------------------------------
def _gcn_conv_kernel(a_ref, x_ref, w_ref, b_ref, h_ref, acc_ref):
    k = pl.program_id(1)

    @pl.when(k == 0)
    def _():
        acc_ref[...] = jnp.zeros_like(acc_ref)

    # bf16 x bf16 MXU matmul, f32 accumulation.
    acc_ref[...] += jnp.dot(a_ref[...], x_ref[...],
                            preferred_element_type=jnp.float32)

    @pl.when(k == pl.num_programs(1) - 1)
    def _():
        # Small per-row-tile transform + bias + ReLU, all in f32; cast only at
        # the final store.
        h = jnp.dot(acc_ref[...], w_ref[...],
                    preferred_element_type=jnp.float32) + b_ref[...]
        h_ref[...] = jnp.maximum(h, 0.0).astype(h_ref.dtype)


def _gcn_conv(a, x, w, b, *, tile_m, tile_k):
    n_pad, f_pad = x.shape
    h_pad = w.shape[1]
    grid = (n_pad // tile_m, n_pad // tile_k)
    return pl.pallas_call(
        _gcn_conv_kernel,
        out_shape=jax.ShapeDtypeStruct((n_pad, h_pad), jnp.bfloat16),
        grid_spec=pltpu.PrefetchScalarGridSpec(
            num_scalar_prefetch=0,
            grid=grid,
            in_specs=[
                pl.BlockSpec((tile_m, tile_k), lambda i, k: (i, k)),   # A tile
                pl.BlockSpec((tile_k, f_pad), lambda i, k: (k, 0)),    # X rows k
                pl.BlockSpec((f_pad, h_pad), lambda i, k: (0, 0)),     # W (resident)
                pl.BlockSpec((1, h_pad), lambda i, k: (0, 0)),         # b (resident)
            ],
            out_specs=pl.BlockSpec((tile_m, h_pad), lambda i, k: (i, 0)),
            scratch_shapes=[pltpu.VMEM((tile_m, h_pad), jnp.float32)],
        ),
        compiler_params=pltpu.CompilerParams(
            dimension_semantics=("parallel", "arbitrary"),
            vmem_limit_bytes=48 * 1024 * 1024,
        ),
    )(a, x, w, b)


# ---------------------------------------------------------------------------
# Kernel 2: second GCNConv + ReLU + global_mean_pool + fc, fully fused.
# pooled[G, H] is accumulated per row tile in VMEM scratch; fc is emitted on
# the very last grid step only.
# ---------------------------------------------------------------------------
def _gcn_conv_pool_fc_kernel(a_ref, h_ref, p_ref, w_ref, b_ref,
                             wfc_ref, bfc_ref, out_ref, acc_ref, pooled_ref):
    i = pl.program_id(0)
    k = pl.program_id(1)
    ni = pl.num_programs(0)
    nk = pl.num_programs(1)

    @pl.when(jnp.logical_and(i == 0, k == 0))
    def _():
        pooled_ref[...] = jnp.zeros_like(pooled_ref)

    @pl.when(k == 0)
    def _():
        acc_ref[...] = jnp.zeros_like(acc_ref)

    acc_ref[...] += jnp.dot(a_ref[...], h_ref[...],
                            preferred_element_type=jnp.float32)

    @pl.when(k == nk - 1)
    def _():
        h2 = jnp.dot(acc_ref[...], w_ref[...],
                     preferred_element_type=jnp.float32) + b_ref[...]
        h2 = jnp.maximum(h2, 0.0)
        # Mean-pool contribution of this row tile: P[:, row_tile] @ H2_tile.
        pooled_ref[...] += jnp.dot(p_ref[...], h2,
                                   preferred_element_type=jnp.float32)

    @pl.when(jnp.logical_and(i == ni - 1, k == nk - 1))
    def _():
        out_ref[...] = (jnp.dot(pooled_ref[...], wfc_ref[...],
                                preferred_element_type=jnp.float32)
                        + bfc_ref[...])


def _gcn_conv_pool_fc(a, h1, p, w, b, wfc, bfc, *, tile_m, tile_k):
    n_pad, h_pad = h1.shape
    g = p.shape[0]
    o_pad = wfc.shape[1]
    grid = (n_pad // tile_m, n_pad // tile_k)
    return pl.pallas_call(
        _gcn_conv_pool_fc_kernel,
        out_shape=jax.ShapeDtypeStruct((g, o_pad), jnp.float32),
        grid_spec=pltpu.PrefetchScalarGridSpec(
            num_scalar_prefetch=0,
            grid=grid,
            in_specs=[
                pl.BlockSpec((tile_m, tile_k), lambda i, k: (i, k)),   # A tile
                pl.BlockSpec((tile_k, h_pad), lambda i, k: (k, 0)),    # H1 rows k
                pl.BlockSpec((g, tile_m), lambda i, k: (0, i)),        # pool cols i
                pl.BlockSpec((h_pad, h_pad), lambda i, k: (0, 0)),     # W2 (resident)
                pl.BlockSpec((1, h_pad), lambda i, k: (0, 0)),         # b2 (resident)
                pl.BlockSpec((h_pad, o_pad), lambda i, k: (0, 0)),     # Wfc (resident)
                pl.BlockSpec((1, o_pad), lambda i, k: (0, 0)),         # bfc (resident)
            ],
            out_specs=pl.BlockSpec((g, o_pad), lambda i, k: (0, 0)),
            scratch_shapes=[pltpu.VMEM((tile_m, h_pad), jnp.float32),
                            pltpu.VMEM((g, h_pad), jnp.float32)],
        ),
        compiler_params=pltpu.CompilerParams(
            # Row axis is sequential: pooled_ref accumulates across row tiles.
            dimension_semantics=("arbitrary", "arbitrary"),
            vmem_limit_bytes=48 * 1024 * 1024,
        ),
    )(a, h1, p, w, b, wfc, bfc)


# ---------------------------------------------------------------------------
# Host-side wrapper: padding to lane-dense / tile-aligned shapes + the two
# pallas calls.
# ---------------------------------------------------------------------------
def _round_up(x, m):
    return ((x + m - 1) // m) * m


def _pad_to(arr, shape):
    pads = [(0, s - d) for d, s in zip(arr.shape, shape)]
    return jnp.pad(arr, pads)


def gcn_forward(a_hat, pool_mat, x, w1, b1, w2, b2, wfc, bfc,
                *, tile_m=128, tile_k=128):
    """Full GCN forward.  Returns [num_graphs, output_dim] float32.

    For large graphs bump tile_m/tile_k (e.g. 256/512); sized so double
    buffering stays well under v7x's 64 MiB VMEM.
    """
    n, f = x.shape
    g = pool_mat.shape[0]
    h = w1.shape[1]
    o = wfc.shape[1]

    n_mult = int(np.lcm(tile_m, tile_k))
    n_pad = _round_up(n, n_mult)
    f_pad = _round_up(f, 128)
    h_pad = _round_up(h, 128)
    o_pad = _round_up(o, 128)

    # bf16 for the O(N^2) adjacency stream and the [N, *] feature streams;
    # f32 for the small resident weights / biases / pool matrix.
    a_p = _pad_to(a_hat.astype(jnp.float32), (n_pad, n_pad)).astype(jnp.bfloat16)
    x_p = _pad_to(x.astype(jnp.float32), (n_pad, f_pad)).astype(jnp.bfloat16)
    p_p = _pad_to(pool_mat.astype(jnp.float32), (g, n_pad))
    w1_p = _pad_to(w1.astype(jnp.float32), (f_pad, h_pad))
    b1_p = _pad_to(b1.astype(jnp.float32), (1, h_pad))
    w2_p = _pad_to(w2.astype(jnp.float32), (h_pad, h_pad))
    b2_p = _pad_to(b2.astype(jnp.float32), (1, h_pad))
    wfc_p = _pad_to(wfc.astype(jnp.float32), (h_pad, o_pad))
    bfc_p = _pad_to(bfc.astype(jnp.float32), (1, o_pad))

    h1 = _gcn_conv(a_p, x_p, w1_p, b1_p, tile_m=tile_m, tile_k=tile_k)
    out = _gcn_conv_pool_fc(a_p, h1, p_p, w2_p, b2_p, wfc_p, bfc_p,
                            tile_m=tile_m, tile_k=tile_k)
    return out[:, :o]


def build_graph_mats(edge_index, batch, num_nodes, num_graphs):
    """Dense normalized adjacency (with self loops) + mean-pool matrix."""
    src, dst = edge_index
    adj = jnp.zeros((num_nodes, num_nodes), jnp.float32)
    adj = adj.at[dst, src].set(1.0)
    adj = adj.at[src, dst].set(1.0)                      # undirected
    adj = adj + jnp.eye(num_nodes, dtype=jnp.float32)    # self loops
    adj = jnp.minimum(adj, 1.0)
    deg = adj.sum(axis=1)
    dinv = jnp.where(deg > 0, 1.0 / jnp.sqrt(deg), 0.0)
    a_hat = adj * dinv[:, None] * dinv[None, :]

    one_hot = (batch[None, :] == jnp.arange(num_graphs)[:, None]).astype(jnp.float32)
    counts = one_hot.sum(axis=1, keepdims=True)
    pool_mat = one_hot / jnp.maximum(counts, 1.0)
    return a_hat, pool_mat


if __name__ == "__main__":
    # 3 graphs of 50 nodes each (N=150 -> padded to 256 => grid (2, 2)),
    # input_dim=8, hidden_dim=32, output_dim=4.
    G, NODES_PER_GRAPH = 3, 50
    N = G * NODES_PER_GRAPH
    input_dim, hidden_dim, output_dim = 8, 32, 4

    key = jax.random.PRNGKey(0)
    k_x, k_w1, k_b1, k_w2, k_b2, k_wfc, k_bfc = jax.random.split(key, 7)

    x = jax.random.normal(k_x, (N, input_dim), jnp.float32)

    # Deterministic edges: a ring inside each graph plus a chord.
    edges = []
    for g in range(G):
        base = g * NODES_PER_GRAPH
        for i in range(NODES_PER_GRAPH):
            edges.append((base + i, base + (i + 1) % NODES_PER_GRAPH))
        edges.append((base + 0, base + NODES_PER_GRAPH // 2))
    edge_index = jnp.array(np.array(edges, dtype=np.int32).T)   # [2, E]
    batch = jnp.array(np.repeat(np.arange(G), NODES_PER_GRAPH).astype(np.int32))

    a_hat, pool_mat = build_graph_mats(edge_index, batch, N, G)

    # Deterministic parameter init (GCNConv weights [in,out], biases [1,out];
    # fc as [hidden,out] so the kernel uses x @ W directly).
    scale = 0.1
    w1 = scale * jax.random.normal(k_w1, (input_dim, hidden_dim), jnp.float32)
    b1 = scale * jax.random.normal(k_b1, (1, hidden_dim), jnp.float32)
    w2 = scale * jax.random.normal(k_w2, (hidden_dim, hidden_dim), jnp.float32)
    b2 = scale * jax.random.normal(k_b2, (1, hidden_dim), jnp.float32)
    wfc = scale * jax.random.normal(k_wfc, (hidden_dim, output_dim), jnp.float32)
    bfc = scale * jax.random.normal(k_bfc, (1, output_dim), jnp.float32)

    fwd = jax.jit(functools.partial(gcn_forward, tile_m=128, tile_k=128))
    out = fwd(a_hat, pool_mat, x, w1, b1, w2, b2, wfc, bfc)
    out = jax.block_until_ready(out)

    # Reference in plain JAX (f32) for a sanity check.
    def ref(x):
        h = jnp.maximum(a_hat @ (x @ w1) + b1, 0.0)
        h = jnp.maximum(a_hat @ (h @ w2) + b2, 0.0)
        return pool_mat @ h @ wfc + bfc

    # bf16 adjacency/feature operands (f32 accumulation) => loosened tolerance.
    np.testing.assert_allclose(np.asarray(out), np.asarray(ref(x)),
                               rtol=2e-2, atol=2e-2)
    print("KERNEL_OK")
</pallas_src>

<mosaic_0001>
module attributes {stable_mosaic.version = 11 : i64} {
  func.func @_gcn_conv_pool_fc_kernel(%arg0: i32, %arg1: i32, %arg2: memref<128x128xbf16, #tpu.memory_space<vmem>>, %arg3: memref<128x128xbf16, #tpu.memory_space<vmem>>, %arg4: memref<3x128xf32, #tpu.memory_space<vmem>>, %arg5: memref<128x128xf32, #tpu.memory_space<vmem>>, %arg6: memref<1x128xf32, #tpu.memory_space<vmem>>, %arg7: memref<128x128xf32, #tpu.memory_space<vmem>>, %arg8: memref<1x128xf32, #tpu.memory_space<vmem>>, %arg9: memref<3x128xf32, #tpu.memory_space<vmem>>, %arg10: memref<128x128xf32, #tpu.memory_space<vmem>>, %arg11: memref<3x128xf32, #tpu.memory_space<vmem>>) attributes {dimension_semantics = [#tpu.dimension_semantics<arbitrary>, #tpu.dimension_semantics<arbitrary>], iteration_bounds = array<i64: 2, 2>, scalar_prefetch = 0 : i64, scratch_operands = 2 : i64, tpu.core_type = #tpu.core_type<tc>, window_params = [{transform_indices = @transform_0, window_bounds = array<i64: 128, 128>}, {transform_indices = @transform_1, window_bounds = array<i64: 128, 128>}, {transform_indices = @transform_2, window_bounds = array<i64: 3, 128>}, {pipeline_mode = #tpu.pipeline_mode<synchronous>, transform_indices = @transform_3, window_bounds = array<i64: 128, 128>}, {pipeline_mode = #tpu.pipeline_mode<synchronous>, transform_indices = @transform_4, window_bounds = array<i64: 1, 128>}, {pipeline_mode = #tpu.pipeline_mode<synchronous>, transform_indices = @transform_5, window_bounds = array<i64: 128, 128>}, {pipeline_mode = #tpu.pipeline_mode<synchronous>, transform_indices = @transform_6, window_bounds = array<i64: 1, 128>}, {pipeline_mode = #tpu.pipeline_mode<synchronous>, transform_indices = @transform_7, window_bounds = array<i64: 3, 128>}]} {
    %c0_i32 = arith.constant 0 : i32
    %0 = arith.cmpi eq, %arg0, %c0_i32 : i32
    %c0_i32_0 = arith.constant 0 : i32
    %1 = arith.cmpi eq, %arg1, %c0_i32_0 : i32
    %2 = arith.andi %0, %1 : i1
    %3 = arith.extui %2 : i1 to i32
    %c0_i32_1 = arith.constant 0 : i32
    %4 = arith.cmpi ne, %3, %c0_i32_1 : i32
    scf.if %4 {
      %cst_15 = arith.constant 0.000000e+00 : f32
      %22 = vector.broadcast %cst_15 : f32 to vector<3x128xf32>
      %c0_16 = arith.constant 0 : index
      %c0_17 = arith.constant 0 : index
      %23 = vector.load %arg11[%c0_16, %c0_17] : memref<3x128xf32, #tpu.memory_space<vmem>>, vector<3x128xf32>
      tpu.vector_store %arg11[%c0_16, %c0_17], %22 {strides = array<i32>} : memref<3x128xf32, #tpu.memory_space<vmem>>, vector<3x128xf32>,
    } else {
    }
    %c0_i32_2 = arith.constant 0 : i32
    %5 = arith.cmpi eq, %arg1, %c0_i32_2 : i32
    %6 = arith.extui %5 : i1 to i32
    %c0_i32_3 = arith.constant 0 : i32
    %7 = arith.cmpi ne, %6, %c0_i32_3 : i32
    scf.if %7 {
      %cst_15 = arith.constant 0.000000e+00 : f32
      %22 = vector.broadcast %cst_15 : f32 to vector<128x128xf32>
      %c0_16 = arith.constant 0 : index
      %c0_17 = arith.constant 0 : index
      %23 = vector.load %arg10[%c0_16, %c0_17] : memref<128x128xf32, #tpu.memory_space<vmem>>, vector<128x128xf32>
      tpu.vector_store %arg10[%c0_16, %c0_17], %22 {strides = array<i32>} : memref<128x128xf32, #tpu.memory_space<vmem>>, vector<128x128xf32>,
    } else {
    }
    %c0 = arith.constant 0 : index
    %c0_4 = arith.constant 0 : index
    %8 = vector.load %arg10[%c0, %c0_4] : memref<128x128xf32, #tpu.memory_space<vmem>>, vector<128x128xf32>
    %c0_5 = arith.constant 0 : index
    %c0_6 = arith.constant 0 : index
    %9 = vector.load %arg2[%c0_5, %c0_6] : memref<128x128xbf16, #tpu.memory_space<vmem>>, vector<128x128xbf16>
    %c0_7 = arith.constant 0 : index
    %c0_8 = arith.constant 0 : index
    %10 = vector.load %arg3[%c0_7, %c0_8] : memref<128x128xbf16, #tpu.memory_space<vmem>>, vector<128x128xbf16>
    %cst = arith.constant dense<0.000000e+00> : vector<128x128xf32>
    %11 = tpu.matmul %9, %10, %cst {dimension_numbers = #tpu.dot_dimension_numbers<[1], [0], [0], [1], [0, 0, 1, 1], [], []>} : vector<128x128xbf16>, vector<128x128xbf16>, vector<128x128xf32> -> vector<128x128xf32>
    %12 = arith.addf %8, %11 : vector<128x128xf32>
    %c0_9 = arith.constant 0 : index
    %c0_10 = arith.constant 0 : index
    %13 = vector.load %arg10[%c0_9, %c0_10] : memref<128x128xf32, #tpu.memory_space<vmem>>, vector<128x128xf32>
    tpu.vector_store %arg10[%c0_9, %c0_10], %12 {strides = array<i32>} : memref<128x128xf32, #tpu.memory_space<vmem>>, vector<128x128xf32>,
    %c1_i32 = arith.constant 1 : i32
    %14 = arith.cmpi eq, %arg1, %c1_i32 : i32
    %15 = arith.extui %14 : i1 to i32
    %c0_i32_11 = arith.constant 0 : i32
    %16 = arith.cmpi ne, %15, %c0_i32_11 : i32
    scf.if %16 {
      %c0_15 = arith.constant 0 : index
      %c0_16 = arith.constant 0 : index
      %22 = vector.load %arg10[%c0_15, %c0_16] : memref<128x128xf32, #tpu.memory_space<vmem>>, vector<128x128xf32>
      %c0_17 = arith.constant 0 : index
      %c0_18 = arith.constant 0 : index
      %23 = vector.load %arg5[%c0_17, %c0_18] : memref<128x128xf32, #tpu.memory_space<vmem>>, vector<128x128xf32>
      %cst_19 = arith.constant dense<0.000000e+00> : vector<128x128xf32>
      %24 = tpu.matmul %22, %23, %cst_19 {dimension_numbers = #tpu.dot_dimension_numbers<[1], [0], [0], [1], [0, 0, 1, 1], [], []>} : vector<128x128xf32>, vector<128x128xf32>, vector<128x128xf32> -> vector<128x128xf32>
      %c0_20 = arith.constant 0 : index
      %c0_21 = arith.constant 0 : index
      %25 = vector.load %arg6[%c0_20, %c0_21] : memref<1x128xf32, #tpu.memory_space<vmem>>, vector<1x128xf32>
      %26 = vector.broadcast %25 : vector<1x128xf32> to vector<128x128xf32>
      %27 = arith.addf %24, %26 : vector<128x128xf32>
      %cst_22 = arith.constant 0.000000e+00 : f32
      %28 = vector.broadcast %cst_22 : f32 to vector<128x128xf32>
      %29 = arith.maximumf %27, %28 : vector<128x128xf32>
      %c0_23 = arith.constant 0 : index
      %c0_24 = arith.constant 0 : index
      %30 = vector.load %arg11[%c0_23, %c0_24] : memref<3x128xf32, #tpu.memory_space<vmem>>, vector<3x128xf32>
      %c0_25 = arith.constant 0 : index
      %c0_26 = arith.constant 0 : index
      %31 = vector.load %arg4[%c0_25, %c0_26] : memref<3x128xf32, #tpu.memory_space<vmem>>, vector<3x128xf32>
      %cst_27 = arith.constant dense<0.000000e+00> : vector<3x128xf32>
      %32 = tpu.matmul %31, %29, %cst_27 {dimension_numbers = #tpu.dot_dimension_numbers<[1], [0], [0], [1], [0, 0, 1, 1], [], []>} : vector<3x128xf32>, vector<128x128xf32>, vector<3x128xf32> -> vector<3x128xf32>
      %33 = arith.addf %30, %32 : vector<3x128xf32>
      %c0_28 = arith.constant 0 : index
      %c0_29 = arith.constant 0 : index
      %34 = vector.load %arg11[%c0_28, %c0_29] : memref<3x128xf32, #tpu.memory_space<vmem>>, vector<3x128xf32>
      tpu.vector_store %arg11[%c0_28, %c0_29], %33 {strides = array<i32>} : memref<3x128xf32, #tpu.memory_space<vmem>>, vector<3x128xf32>,
    } else {
    }
    %c1_i32_12 = arith.constant 1 : i32
    %17 = arith.cmpi eq, %arg0, %c1_i32_12 : i32
    %c1_i32_13 = arith.constant 1 : i32
    %18 = arith.cmpi eq, %arg1, %c1_i32_13 : i32
    %19 = arith.andi %17, %18 : i1
    %20 = arith.extui %19 : i1 to i32
    %c0_i32_14 = arith.constant 0 : i32
    %21 = arith.cmpi ne, %20, %c0_i32_14 : i32
    scf.if %21 {
      %c0_15 = arith.constant 0 : index
      %c0_16 = arith.constant 0 : index
      %22 = vector.load %arg11[%c0_15, %c0_16] : memref<3x128xf32, #tpu.memory_space<vmem>>, vector<3x128xf32>
      %c0_17 = arith.constant 0 : index
      %c0_18 = arith.constant 0 : index
      %23 = vector.load %arg7[%c0_17, %c0_18] : memref<128x128xf32, #tpu.memory_space<vmem>>, vector<128x128xf32>
      %cst_19 = arith.constant dense<0.000000e+00> : vector<3x128xf32>
      %24 = tpu.matmul %22, %23, %cst_19 {dimension_numbers = #tpu.dot_dimension_numbers<[1], [0], [0], [1], [0, 0, 1, 1], [], []>} : vector<3x128xf32>, vector<128x128xf32>, vector<3x128xf32> -> vector<3x128xf32>
      %c0_20 = arith.constant 0 : index
      %c0_21 = arith.constant 0 : index
      %25 = vector.load %arg8[%c0_20, %c0_21] : memref<1x128xf32, #tpu.memory_space<vmem>>, vector<1x128xf32>
      %26 = vector.broadcast %25 : vector<1x128xf32> to vector<3x128xf32>
      %27 = arith.addf %24, %26 : vector<3x128xf32>
      %c0_22 = arith.constant 0 : index
      %c0_23 = arith.constant 0 : index
      %28 = vector.load %arg9[%c0_22, %c0_23] : memref<3x128xf32, #tpu.memory_space<vmem>>, vector<3x128xf32>
      tpu.vector_store %arg9[%c0_22, %c0_23], %27 {strides = array<i32>} : memref<3x128xf32, #tpu.memory_space<vmem>>, vector<3x128xf32>,
    } else {
    }
    return
  }
  func.func @transform_0(%arg0: i32, %arg1: i32) -> (i32, i32) {
    %c0_i32 = arith.constant 0 : i32
    return %arg0, %arg1 : i32, i32
  }
  func.func @transform_1(%arg0: i32, %arg1: i32) -> (i32, i32) {
    %c0_i32 = arith.constant 0 : i32
    %c0_i32_0 = arith.constant 0 : i32
    return %arg1, %c0_i32 : i32, i32
  }
  func.func @transform_2(%arg0: i32, %arg1: i32) -> (i32, i32) {
    %c0_i32 = arith.constant 0 : i32
    %c0_i32_0 = arith.constant 0 : i32
    return %c0_i32, %arg0 : i32, i32
  }
  func.func @transform_3(%arg0: i32, %arg1: i32) -> (i32, i32) {
    %c0_i32 = arith.constant 0 : i32
    %c0_i32_0 = arith.constant 0 : i32
    %c0_i32_1 = arith.constant 0 : i32
    return %c0_i32, %c0_i32_0 : i32, i32
  }
  func.func @transform_4(%arg0: i32, %arg1: i32) -> (i32, i32) {
    %c0_i32 = arith.constant 0 : i32
    %c0_i32_0 = arith.constant 0 : i32
    %c0_i32_1 = arith.constant 0 : i32
    return %c0_i32, %c0_i32_0 : i32, i32
  }
  func.func @transform_5(%arg0: i32, %arg1: i32) -> (i32, i32) {
    %c0_i32 = arith.constant 0 : i32
    %c0_i32_0 = arith.constant 0 : i32
    %c0_i32_1 = arith.constant 0 : i32
    return %c0_i32, %c0_i32_0 : i32, i32
  }
  func.func @transform_6(%arg0: i32, %arg1: i32) -> (i32, i32) {
    %c0_i32 = arith.constant 0 : i32
    %c0_i32_0 = arith.constant 0 : i32
    %c0_i32_1 = arith.constant 0 : i32
    return %c0_i32, %c0_i32_0 : i32, i32
  }
  func.func @transform_7(%arg0: i32, %arg1: i32) -> (i32, i32) {
    %c0_i32 = arith.constant 0 : i32
    %c0_i32_0 = arith.constant 0 : i32
    %c0_i32_1 = arith.constant 0 : i32
    return %c0_i32, %c0_i32_0 : i32, i32
  }
}

module attributes {stable_mosaic.version = 11 : i64} {
  func.func @_gcn_conv_kernel(%arg0: i32, %arg1: i32, %arg2: memref<128x128xbf16, #tpu.memory_space<vmem>>, %arg3: memref<128x128xbf16, #tpu.memory_space<vmem>>, %arg4: memref<128x128xf32, #tpu.memory_space<vmem>>, %arg5: memref<1x128xf32, #tpu.memory_space<vmem>>, %arg6: memref<128x128xbf16, #tpu.memory_space<vmem>>, %arg7: memref<128x128xf32, #tpu.memory_space<vmem>>) attributes {dimension_semantics = [#tpu.dimension_semantics<parallel>, #tpu.dimension_semantics<arbitrary>], iteration_bounds = array<i64: 2, 2>, scalar_prefetch = 0 : i64, scratch_operands = 1 : i64, tpu.core_type = #tpu.core_type<tc>, window_params = [{transform_indices = @transform_0, window_bounds = array<i64: 128, 128>}, {transform_indices = @transform_1, window_bounds = array<i64: 128, 128>}, {pipeline_mode = #tpu.pipeline_mode<synchronous>, transform_indices = @transform_2, window_bounds = array<i64: 128, 128>}, {pipeline_mode = #tpu.pipeline_mode<synchronous>, transform_indices = @transform_3, window_bounds = array<i64: 1, 128>}, {transform_indices = @transform_4, window_bounds = array<i64: 128, 128>}]} {
    %c0_i32 = arith.constant 0 : i32
    %0 = arith.cmpi eq, %arg1, %c0_i32 : i32
    %1 = arith.extui %0 : i1 to i32
    %c0_i32_0 = arith.constant 0 : i32
    %2 = arith.cmpi ne, %1, %c0_i32_0 : i32
    scf.if %2 {
      %cst_9 = arith.constant 0.000000e+00 : f32
      %12 = vector.broadcast %cst_9 : f32 to vector<128x128xf32>
      %c0_10 = arith.constant 0 : index
      %c0_11 = arith.constant 0 : index
      %13 = vector.load %arg7[%c0_10, %c0_11] : memref<128x128xf32, #tpu.memory_space<vmem>>, vector<128x128xf32>
      tpu.vector_store %arg7[%c0_10, %c0_11], %12 {strides = array<i32>} : memref<128x128xf32, #tpu.memory_space<vmem>>, vector<128x128xf32>,
    } else {
    }
    %c0 = arith.constant 0 : index
    %c0_1 = arith.constant 0 : index
    %3 = vector.load %arg7[%c0, %c0_1] : memref<128x128xf32, #tpu.memory_space<vmem>>, vector<128x128xf32>
    %c0_2 = arith.constant 0 : index
    %c0_3 = arith.constant 0 : index
    %4 = vector.load %arg2[%c0_2, %c0_3] : memref<128x128xbf16, #tpu.memory_space<vmem>>, vector<128x128xbf16>
    %c0_4 = arith.constant 0 : index
    %c0_5 = arith.constant 0 : index
    %5 = vector.load %arg3[%c0_4, %c0_5] : memref<128x128xbf16, #tpu.memory_space<vmem>>, vector<128x128xbf16>
    %cst = arith.constant dense<0.000000e+00> : vector<128x128xf32>
    %6 = tpu.matmul %4, %5, %cst {dimension_numbers = #tpu.dot_dimension_numbers<[1], [0], [0], [1], [0, 0, 1, 1], [], []>} : vector<128x128xbf16>, vector<128x128xbf16>, vector<128x128xf32> -> vector<128x128xf32>
    %7 = arith.addf %3, %6 : vector<128x128xf32>
    %c0_6 = arith.constant 0 : index
    %c0_7 = arith.constant 0 : index
    %8 = vector.load %arg7[%c0_6, %c0_7] : memref<128x128xf32, #tpu.memory_space<vmem>>, vector<128x128xf32>
    tpu.vector_store %arg7[%c0_6, %c0_7], %7 {strides = array<i32>} : memref<128x128xf32, #tpu.memory_space<vmem>>, vector<128x128xf32>,
    %c1_i32 = arith.constant 1 : i32
    %9 = arith.cmpi eq, %arg1, %c1_i32 : i32
    %10 = arith.extui %9 : i1 to i32
    %c0_i32_8 = arith.constant 0 : i32
    %11 = arith.cmpi ne, %10, %c0_i32_8 : i32
    scf.if %11 {
      %c0_9 = arith.constant 0 : index
      %c0_10 = arith.constant 0 : index
      %12 = vector.load %arg7[%c0_9, %c0_10] : memref<128x128xf32, #tpu.memory_space<vmem>>, vector<128x128xf32>
      %c0_11 = arith.constant 0 : index
      %c0_12 = arith.constant 0 : index
      %13 = vector.load %arg4[%c0_11, %c0_12] : memref<128x128xf32, #tpu.memory_space<vmem>>, vector<128x128xf32>
      %cst_13 = arith.constant dense<0.000000e+00> : vector<128x128xf32>
      %14 = tpu.matmul %12, %13, %cst_13 {dimension_numbers = #tpu.dot_dimension_numbers<[1], [0], [0], [1], [0, 0, 1, 1], [], []>} : vector<128x128xf32>, vector<128x128xf32>, vector<128x128xf32> -> vector<128x128xf32>
      %c0_14 = arith.constant 0 : index
      %c0_15 = arith.constant 0 : index
      %15 = vector.load %arg5[%c0_14, %c0_15] : memref<1x128xf32, #tpu.memory_space<vmem>>, vector<1x128xf32>
      %16 = vector.broadcast %15 : vector<1x128xf32> to vector<128x128xf32>
      %17 = arith.addf %14, %16 : vector<128x128xf32>
      %cst_16 = arith.constant 0.000000e+00 : f32
      %18 = vector.broadcast %cst_16 : f32 to vector<128x128xf32>
      %19 = arith.maximumf %17, %18 : vector<128x128xf32>
      %20 = arith.truncf %19 : vector<128x128xf32> to vector<128x128xbf16>
      %c0_17 = arith.constant 0 : index
      %c0_18 = arith.constant 0 : index
      %21 = vector.load %arg6[%c0_17, %c0_18] : memref<128x128xbf16, #tpu.memory_space<vmem>>, vector<128x128xbf16>
      tpu.vector_store %arg6[%c0_17, %c0_18], %20 {strides = array<i32>} : memref<128x128xbf16, #tpu.memory_space<vmem>>, vector<128x128xbf16>,
    } else {
    }
    return
  }
  func.func @transform_0(%arg0: i32, %arg1: i32) -> (i32, i32) {
    %c0_i32 = arith.constant 0 : i32
    return %arg0, %arg1 : i32, i32
  }
  func.func @transform_1(%arg0: i32, %arg1: i32) -> (i32, i32) {
    %c0_i32 = arith.constant 0 : i32
    %c0_i32_0 = arith.constant 0 : i32
    return %arg1, %c0_i32 : i32, i32
  }
  func.func @transform_2(%arg0: i32, %arg1: i32) -> (i32, i32) {
    %c0_i32 = arith.constant 0 : i32
    %c0_i32_0 = arith.constant 0 : i32
    %c0_i32_1 = arith.constant 0 : i32
    return %c0_i32, %c0_i32_0 : i32, i32
  }
  func.func @transform_3(%arg0: i32, %arg1: i32) -> (i32, i32) {
    %c0_i32 = arith.constant 0 : i32
    %c0_i32_0 = arith.constant 0 : i32
    %c0_i32_1 = arith.constant 0 : i32
    return %c0_i32, %c0_i32_0 : i32, i32
  }
  func.func @transform_4(%arg0: i32, %arg1: i32) -> (i32, i32) {
    %c0_i32 = arith.constant 0 : i32
    %c0_i32_0 = arith.constant 0 : i32
    return %arg0, %c0_i32 : i32, i32
  }
}

</mosaic_0001>

<bundles_post_ra>
// kernel: gcn_forward.2
= control target key start
LH: loop header
LB: loop body
LE: loop exit
PB: predicated region body
PF: predicated region fallthrough
CT: control target
= control target key end

     0   :  { %s1462_s15 = smov 0   ;;  %s1464_s16 = smov 0   ;;  %s1655_s0 = inlined_call_operand.vmem [shape: bf16[256,256], index: 0, kind: input, shape index: {}]   ;;  %s1656_s1 = inlined_call_operand.vmem [shape: bf16[256,128], index: 1, kind: input, shape index: {}]   ;;  %s1657_s2 = inlined_call_operand.vmem [shape: f32[128,128], index: 2, kind: input, shape index: {}]   ;;  %s1658_s3 = inlined_call_operand.vmem [shape: f32[1,128], index: 3, kind: input, shape index: {}]   ;;  %s1659_s4 = inlined_call_operand.vmem [shape: bf16[256,128], index: 4, kind: output, shape index: {}]  }
   0x1   :  { %s1466_s17 = smov 0   ;;  %s1468_s18 = smov 0  }
   0x2   :  { %s1470_s19 = smov 0   ;;  %s1472_s20 = smov 0  }
   0x3   :  { %s1474_s21 = smov 0  }
   0x4 LB: > { %s23_s22 = sadd.s32 1, %s1426_s19  ;;  %s26_s23 = sadd.s32 1, %s1430_s20  ;;  %s1434_s21 = sphi %s1474_s21, %s14_s21   ;;  %s1430_s20 = sphi %s1472_s20, %s1665_s20   ;;  %s1426_s19 = sphi %s1470_s19, %s1664_s19   ;;  %s1422_s18 = sphi %s1468_s18, %s1663_s18   ;;  %s1418_s17 = sphi %s1466_s17, %s1662_s17   ;;  %s1414_s16 = sphi %s1464_s16, %s1661_s16   ;;  %s1410_s15 = sphi %s1462_s15, %s1660_s15  }
   0x5   : > { %p24_p0 = scmp.ge.s32.totalorder %s23_s22, 2  ;;  %p42_p1 = scmp.ne.s32.totalorder %s1414_s16, %s1410_s15 }
   0x6   : > { %p43_p2 = scmp.eq.s32.totalorder %s1434_s21, 0  ;;  %s35_s27 = sadd.s32 1, %s1414_s16 }
   0x7   : > { %s1667_s22 = smov (%p24_p0, %s23_s22), 0  ;;  %s1669_s23 = smov (!%p24_p0, %s26_s23), %s1430_s20 }
   0x8   : > { %p44_p3 = por %p43_p2, %p42_p1  ;;  %p28_p4 = scmp.ge.s32.totalorder %s1669_s23, 2 }
   0x9   : > { %s31_s24 = ssub.s32 %s1426_s19, %s1667_s22  ;;  %p1011_p6 = scmp.ge.s32.totalorder %s1434_s21, 4 }
   0xa   : > { %s1671_s23 = smov (%p28_p4, %s1669_s23), 0 }
   0xb   : > { %s30_s25 = ssub.s32 %s1430_s20, %s1671_s23  ;;  %168 = sbr.rel (%p1011_p6) target bundleno = 32 (0x20), region = 24 }
   0xc   : > { %s32_s26 = sor.u32 %s31_s24, %s30_s25 }
   0xd   : > { %p33_p5 = scmp.eq.s32.totalorder %s32_s26, 0 }
   0xf   : > { %s1513_s28 = scalar_select %p33_p5, %s1414_s16, %s35_s27  }
  0x10   : > { %171 = sbr.rel (!%p44_p3) target bundleno = 32 (0x20), region = 28  ;;  %s173_s29 = sand.u32 (%p44_p3), 1, %s1414_s16  }
  0x11   : > { %s1059_s30 = sshll.u32 (%p44_p3), %s1430_s20, 5  ;;  %s1012_s5 = sshll.u32 (%p44_p3), %s173_s29, 6 }
  0x12   : > { %s178_s6 = sadd.s32 (%p44_p3), %s1426_s19, %s1059_s30  ;;  %s175_s11 = scalar_lea.vmem (%p44_p3), [#allocation3], %s1012_s5 }
  0x13   : > { %s1015_s7 = sshll.u32 (%p44_p3), %s178_s6, 2 }
  0x14   : > { %s1522_s10 = scalar_lea.vmem (%p44_p3), %s1655_s0, %s1015_s7 }
  0x15   : > { %v197_v0 = vld [vmem:[%s1522_s10] sm:$0xf]  ;;  %v199_v1 = vld [vmem:[%s1522_s10 + $0x8] sm:$0xf]  ;;  %v201_v2 = vld [vmem:[%s1522_s10 + $0x10] sm:$0xf] }
  0x16   : > { %198 = vst [vmem:[%s175_s11] sm:$0xf] %v197_v0  ;;  %200 = vst [vmem:[%s175_s11 + $0x4] sm:$0xf] %v199_v1  ;;  %v203_v3 = vld [vmem:[%s1522_s10 + $0x18] sm:$0xf] }
  0x17   : > { %202 = vst [vmem:[%s175_s11 + $0x8] sm:$0xf] %v201_v2  ;;  %v205_v4 = vld [vmem:[%s1522_s10 + $0x20] sm:$0xf]  ;;  %v207_v5 = vld [vmem:[%s1522_s10 + $0x28] sm:$0xf] }
  0x18   : > { %204 = vst [vmem:[%s175_s11 + $0xc] sm:$0xf] %v203_v3  ;;  %206 = vst [vmem:[%s175_s11 + $0x10] sm:$0xf] %v205_v4  ;;  %v209_v6 = vld [vmem:[%s1522_s10 + $0x30] sm:$0xf] }
  0x19   : > { %208 = vst [vmem:[%s175_s11 + $0x14] sm:$0xf] %v207_v5  ;;  %v211_v7 = vld [vmem:[%s1522_s10 + $0x38] sm:$0xf]  ;;  %v213_v8 = vld [vmem:[%s1522_s10 + $0x40] sm:$0xf] }
  0x1a   : > { %210 = vst [vmem:[%s175_s11 + $0x18] sm:$0xf] %v209_v6  ;;  %212 = vst [vmem:[%s175_s11 + $0x1c] sm:$0xf] %v211_v7  ;;  %v215_v9 = vld [vmem:[%s1522_s10 + $0x48] sm:$0xf] }
  0x1b   : > { %214 = vst [vmem:[%s175_s11 + $0x20] sm:$0xf] %v213_v8  ;;  %v217_v10 = vld [vmem:[%s1522_s10 + $0x50] sm:$0xf]  ;;  %v219_v11 = vld [vmem:[%s1522_s10 + $0x58] sm:$0xf] }
  0x1c   : > { %216 = vst [vmem:[%s175_s11 + $0x24] sm:$0xf] %v215_v9  ;;  %218 = vst [vmem:[%s175_s11 + $0x28] sm:$0xf] %v217_v10  ;;  %v221_v12 = vld [vmem:[%s1522_s10 + $0x60] sm:$0xf] }
  0x1d   : > { %220 = vst [vmem:[%s175_s11 + $0x2c] sm:$0xf] %v219_v11  ;;  %v223_v13 = vld [vmem:[%s1522_s10 + $0x68] sm:$0xf]  ;;  %v225_v14 = vld [vmem:[%s1522_s10 + $0x70] sm:$0xf] }
  0x1e   : > { %222 = vst [vmem:[%s175_s11 + $0x30] sm:$0xf] %v221_v12  ;;  %224 = vst [vmem:[%s175_s11 + $0x34] sm:$0xf] %v223_v13  ;;  %v227_v15 = vld [vmem:[%s1522_s10 + $0x78] sm:$0xf] }
  0x1f   : > { %226 = vst [vmem:[%s175_s11 + $0x38] sm:$0xf] %v225_v14  ;;  %228 = vst [vmem:[%s175_s11 + $0x3c] sm:$0xf] %v227_v15 }
  0x20 PF: > { %p1016_p7 = scmp.ge.s32.totalorder %s1434_s21, 1  ;;  %p292_p8 = scmp.lt.s32.totalorder %s1434_s21, 5 }
  0x22   : > { %p293_p9 = pnand %p1016_p7, %p292_p8 }
  0x23   : > { %s299_s12 = sand.u32 (!%p293_p9), 1, %s1410_s15   ;;  %s1018_s13 = sshll.u32 (!%p293_p9), %s1418_s17, 4 }
  0x24   : > { %296 = sbr.rel (%p293_p9) target bundleno = 549 (0x225), region = 73  ;;  %s1017_s14 = sshll.u32 (!%p293_p9), %s299_s12, 6 }
  0x25   : > { %p331_p10 = scmp.lt.s32.totalorder (!%p293_p9), %s1018_s13, 31  ;;  %s1020_s24 = sshll.u32 (!%p293_p9), %s1422_s18, 4 }
  0x26   : > { %p337_p11 = scmp.lt.s32.totalorder (!%p293_p9), %s1020_s24, 31  ;;  %s1555_s15 = scalar_lea.vmem (!%p293_p9), [#allocation3], %s1017_s14 }
  0x27   : > { %p1022_p12 = scmp.ne.s32.totalorder (!%p293_p9), %s1418_s17, 0 }
  0x29   : > { %s1673_s13 = smov (!%p331_p10, %s1018_s13), 31  ;;  %s1675_s24 = smov (!%p337_p11, %s1020_s24), 31 }
  0x2a   : > { %s1019_s25 = sshll.u32 %s1673_s13, 2  ;;  %s1021_s30 = sshll.u32 %s1675_s24, 2 }
  0x2b   : > { %s1548_s29 = scalar_lea.vmem %s1656_s1, %s1019_s25  ;;  %s1553_s7 = scalar_lea.vmem %s1659_s4, %s1021_s30 }
  0x2c   : > { %346 = sbr.rel (%p1022_p12) target bundleno = 58 (0x3a), region = 81 }
  0x31   : > { %v1436_v16 = vmov 0.0  }
  0x32   : > { %347 = vst [vmem:[#allocation2 + $0x30] sm:$0xff] %v1436_v16  ;;  %348 = vst [vmem:[#allocation2] sm:$0xff] %v1436_v16 }
  0x33   : > { %349 = vst [vmem:[#allocation2 + $0x58] sm:$0xff] %v1436_v16  ;;  %350 = vst [vmem:[#allocation2 + $0x18] sm:$0xff] %v1436_v16 }
  0x34   : > { %351 = vst [vmem:[#allocation2 + $0x50] sm:$0xff] %v1436_v16  ;;  %352 = vst [vmem:[#allocation2 + $0x68] sm:$0xff] %v1436_v16 }
  0x35   : > { %353 = vst [vmem:[#allocation2 + $0x8] sm:$0xff] %v1436_v16  ;;  %354 = vst [vmem:[#allocation2 + $0x48] sm:$0xff] %v1436_v16 }
  0x36   : > { %355 = vst [vmem:[#allocation2 + $0x40] sm:$0xff] %v1436_v16  ;;  %356 = vst [vmem:[#allocation2 + $0x20] sm:$0xff] %v1436_v16 }
  0x37   : > { %357 = vst [vmem:[#allocation2 + $0x10] sm:$0xff] %v1436_v16  ;;  %358 = vst [vmem:[#allocation2 + $0x38] sm:$0xff] %v1436_v16 }
  0x38   : > { %359 = vst [vmem:[#allocation2 + $0x60] sm:$0xff] %v1436_v16  ;;  %360 = vst [vmem:[#allocation2 + $0x70] sm:$0xff] %v1436_v16 }
  0x39   : > { %361 = vst [vmem:[#allocation2 + $0x78] sm:$0xff] %v1436_v16  ;;  %362 = vst [vmem:[#allocation2 + $0x28] sm:$0xff] %v1436_v16 }
  0x3a PF: > { %v1364_v17 = vld [vmem:[%s1548_s29 + $0x38] sm:$0xff]   ;;  %v1365_v18 = vld [vmem:[%s1548_s29 + $0x30] sm:$0xff]   ;;  %v1366_v19 = vld [vmem:[%s1548_s29 + $0x28] sm:$0xff]   ;;  %p1039_p13 = scmp.ne.s32.totalorder %s1418_s17, 1 }
  0x3b   : > { %1171 = vmatprep.subr.bf16.mxu0 %v1364_v17  ;;  %1259 = vmatprep.subr.bf16.mxu1 %v1364_v17  ;;  %v1367_v20 = vld [vmem:[%s1548_s29 + $0x20] sm:$0xff]   ;;  %v1368_v23 = vld [vmem:[%s1548_s29 + $0x18] sm:$0xff]   ;;  %v1369_v24 = vld [vmem:[%s1548_s29 + $0x10] sm:$0xff]  }
  0x3c   : > { %1172 = vmatpush3.bf16.msra.mxu0 %v1364_v17  ;;  %1267 = vmatpush3.bf16.msra.mxu1 %v1364_v17  ;;  %v1372_v21 = vld [vmem:[%s1555_s15] sm:$0xff]   ;;  %v1370_v25 = vld [vmem:[%s1548_s29 + $0x8] sm:$0xff]   ;;  %v1376_v29 = vld [vmem:[%s1555_s15 + $0x10] sm:$0xff]  }
  0x3d   : > { %1173 = vmatprep.subr.bf16.mxu0 %v1365_v18  ;;  %1260 = vmatprep.subr.bf16.mxu1 %v1365_v18  ;;  %v1373_v22 = vld [vmem:[%s1555_s15 + $0x20] sm:$0xff]   ;;  %v1374_v27 = vld [vmem:[%s1555_s15 + $0x8] sm:$0xff]   ;;  %v1377_v30 = vld [vmem:[%s1555_s15 + $0x30] sm:$0xff]  }
  0x3e   : > { %1187 = vmatprep.mubr.bf16.mxu0 %v1372_v21  ;;  %1195 = vmatprep.mubr.bf16.mxu1 %v1373_v22  ;;  %v1371_v26 = vld [vmem:[%s1548_s29] sm:$0xff]   ;;  %v1375_v28 = vld [vmem:[%s1555_s15 + $0x28] sm:$0xff]   ;;  %v1378_v31 = vld [vmem:[%s1555_s15 + $0x18] sm:$0xff]  }
  0x3f   : > { %v1379_v32 = vld [vmem:[%s1555_s15 + $0x38] sm:$0xff]   ;;  %v373_v34 = vld [vmem:[#allocation2 + $0x10] sm:$0xff]  ;;  %v371_v38 = vld [vmem:[#allocation2 + $0x40] sm:$0xff] }
  0x40   : > { %1174 = vmatpush3.bf16.msra.mxu0 %v1365_v18  ;;  %1268 = vmatpush3.bf16.msra.mxu1 %v1365_v18  ;;  %v365_v33 = vld [vmem:[#allocation2 + $0x58] sm:$0xff]  ;;  %v363_v37 = vld [vmem:[#allocation2 + $0x30] sm:$0xff]  ;;  %v364_v49 = vld [vmem:[#allocation2] sm:$0xff] }
  0x41   : > { %1175 = vmatprep.subr.bf16.mxu0 %v1366_v19  ;;  %1261 = vmatprep.subr.bf16.mxu1 %v1366_v19  ;;  %v366_v43 = vld [vmem:[#allocation2 + $0x18] sm:$0xff]  ;;  %v372_v50 = vld [vmem:[#allocation2 + $0x20] sm:$0xff]  ;;  %v369_v55 = vld [vmem:[#allocation2 + $0x8] sm:$0xff] }
  0x42   : > { %v374_v44 = vld [vmem:[#allocation2 + $0x38] sm:$0xff]  ;;  %v367_v61 = vld [vmem:[#allocation2 + $0x50] sm:$0xff]  ;;  %v375_v62 = vld [vmem:[#allocation2 + $0x60] sm:$0xff] }
  0x43   : > { %v377_v56 = vld [vmem:[#allocation2 + $0x78] sm:$0xff]  ;;  %v370_v3 = vld [vmem:[#allocation2 + $0x48] sm:$0xff]  ;;  %v376_v10 = vld [vmem:[#allocation2 + $0x70] sm:$0xff] }
  0x44   : > { %1176 = vmatpush3.bf16.msra.mxu0 %v1366_v19  ;;  %1269 = vmatpush3.bf16.msra.mxu1 %v1366_v19  ;;  %v378_v4 = vld [vmem:[#allocation2 + $0x28] sm:$0xff] }
  0x45   : > { %1177 = vmatprep.subr.bf16.mxu0 %v1367_v20  ;;  %1262 = vmatprep.subr.bf16.mxu1 %v1367_v20  ;;  %v368_v9 = vld [vmem:[#allocation2 + $0x68] sm:$0xff] }
  0x48   : > { %1178 = vmatpush3.bf16.msra.mxu0 %v1367_v20  ;;  %1270 = vmatpush3.bf16.msra.mxu1 %v1367_v20 }
  0x49   : > { %1179 = vmatprep.subr.bf16.mxu0 %v1368_v23  ;;  %1263 = vmatprep.subr.bf16.mxu1 %v1368_v23 }
  0x4c   : > { %1180 = vmatpush3.bf16.msra.mxu0 %v1368_v23  ;;  %1271 = vmatpush3.bf16.msra.mxu1 %v1368_v23 }
  0x4d   : > { %1181 = vmatprep.subr.bf16.mxu0 %v1369_v24  ;;  %1264 = vmatprep.subr.bf16.mxu1 %v1369_v24 }
  0x50   : > { %1182 = vmatpush3.bf16.msra.mxu0 %v1369_v24  ;;  %1272 = vmatpush3.bf16.msra.mxu1 %v1369_v24 }
  0x51   : > { %1183 = vmatprep.subr.bf16.mxu0 %v1370_v25  ;;  %1265 = vmatprep.subr.bf16.mxu1 %v1370_v25 }
  0x54   : > { %1184 = vmatpush3.bf16.msra.mxu0 %v1370_v25  ;;  %1273 = vmatpush3.bf16.msra.mxu1 %v1370_v25 }
  0x55   : > { %1185 = vmatprep.subr.bf16.mxu0 %v1371_v26  ;;  %1266 = vmatprep.subr.bf16.mxu1 %v1371_v26 }
  0x58   : > { %1186 = vmatpush3.bf16.msra.mxu0 %v1371_v26  ;;  %1274 = vmatpush3.bf16.msra.mxu1 %v1371_v26 }
  0x5b   : > { %1188 = vmatmul.mubr.bf16.vlgmr.msra.gmra.mxu0 %v1374_v27  ;;  %1196 = vmatmul.mubr.bf16.vlgmr.msra.gmra.mxu1 %v1375_v28 }
  0x5c   : > { %1191 = vmatprep.mubr.bf16.mxu0 %v1376_v29  ;;  %1199 = vmatprep.mubr.bf16.mxu1 %v1377_v30 }
  0x63   : > { %1192 = vmatmul.mubr.bf16.gmra.mxu0 %v1378_v31  ;;  %1200 = vmatmul.mubr.bf16.gmra.mxu1 %v1379_v32 }
 0x11b   : > { %v1189_v35 = vpop.f32.mrf.mxu0  ;;  %v1197_v36 = vpop.f32.mrf.mxu1 }
 0x11c   : > { %v606_v39 = vadd.f32 %v1189_v35, %v365_v33  ;;  %v614_v40 = vadd.f32 %v1197_v36, %v373_v34 }
 0x11d   : > { %v541_v41 = vpop.f32.mrf.mxu0  ;;  %v573_v42 = vpop.f32.mrf.mxu1 }
 0x11e   : > { %622 = vst [vmem:[#allocation2 + $0x58] sm:$0xff] %v606_v39  ;;  %630 = vst [vmem:[#allocation2 + $0x10] sm:$0xff] %v614_v40  ;;  %v604_v45 = vadd.f32 %v541_v41, %v363_v37  ;;  %v612_v46 = vadd.f32 %v573_v42, %v371_v38 }
 0x11f   : > { %v1190_v47 = vpop.f32.mrf.mxu0  ;;  %v1198_v48 = vpop.f32.mrf.mxu1 }
 0x120   : > { %620 = vst [vmem:[#allocation2 + $0x30] sm:$0xff] %v604_v45  ;;  %628 = vst [vmem:[#allocation2 + $0x40] sm:$0xff] %v612_v46  ;;  %v607_v51 = vadd.f32 %v1190_v47, %v366_v43  ;;  %v615_v52 = vadd.f32 %v1198_v48, %v374_v44 }
 0x121   : > { %v544_v53 = vpop.f32.mrf.mxu0  ;;  %v576_v54 = vpop.f32.mrf.mxu1 }
 0x122   : > { %623 = vst [vmem:[#allocation2 + $0x18] sm:$0xff] %v607_v51  ;;  %631 = vst [vmem:[#allocation2 + $0x38] sm:$0xff] %v615_v52  ;;  %v605_v57 = vadd.f32 %v544_v53, %v364_v49  ;;  %v613_v58 = vadd.f32 %v576_v54, %v372_v50 }
 0x123   : > { %v1193_v59 = vpop.f32.mrf.mxu0  ;;  %v1201_v60 = vpop.f32.mrf.mxu1 }
 0x124   : > { %621 = vst [vmem:[#allocation2] sm:$0xff] %v605_v57  ;;  %629 = vst [vmem:[#allocation2 + $0x20] sm:$0xff] %v613_v58  ;;  %v610_v63 = vadd.f32 %v1193_v59, %v369_v55  ;;  %v618_v0 = vadd.f32 %v1201_v60, %v377_v56 }
 0x125   : > { %v557_v1 = vpop.f32.mrf.mxu0  ;;  %v589_v2 = vpop.f32.mrf.mxu1 }
 0x126   : > { %626 = vst [vmem:[#allocation2 + $0x8] sm:$0xff] %v610_v63  ;;  %634 = vst [vmem:[#allocation2 + $0x78] sm:$0xff] %v618_v0  ;;  %v608_v5 = vadd.f32 %v557_v1, %v367_v61  ;;  %v616_v6 = vadd.f32 %v589_v2, %v375_v62 }
 0x127   : > { %v1194_v7 = vpop.f32.mrf.mxu0  ;;  %v1202_v8 = vpop.f32.mrf.mxu1 }
 0x128   : > { %624 = vst [vmem:[#allocation2 + $0x50] sm:$0xff] %v608_v5  ;;  %632 = vst [vmem:[#allocation2 + $0x60] sm:$0xff] %v616_v6  ;;  %v611_v11 = vadd.f32 %v1194_v7, %v370_v3  ;;  %v619_v12 = vadd.f32 %v1202_v8, %v378_v4  ;;  %639 = sbr.rel (%p1039_p13) target bundleno = 549 (0x225), region = 85 }
 0x129   : > { %v560_v13 = vpop.f32.mrf.mxu0  ;;  %v592_v14 = vpop.f32.mrf.mxu1 }
 0x12a   : > { %627 = vst [vmem:[#allocation2 + $0x48] sm:$0xff] %v611_v11  ;;  %635 = vst [vmem:[#allocation2 + $0x28] sm:$0xff] %v619_v12  ;;  %v609_v15 = vadd.f32 %v560_v13, %v368_v9  ;;  %v617_v16 = vadd.f32 %v592_v14, %v376_v10 }
 0x12c   : > { %625 = vst [vmem:[#allocation2 + $0x68] sm:$0xff] %v609_v15  ;;  %633 = vst [vmem:[#allocation2 + $0x70] sm:$0xff] %v617_v16 }
 0x12d   : > { %v671_v17 = vld [vmem:[%s1657_s2 + $0x78] sm:$0xff]  ;;  %v670_v18 = vld [vmem:[%s1657_s2 + $0x70] sm:$0xff]  ;;  %v669_v19 = vld [vmem:[%s1657_s2 + $0x68] sm:$0xff] }
 0x12e   : > { %1203 = vmatprep.subr.mxu0 %v671_v17  ;;  %1275 = vmatprep.subr.mxu1 %v671_v17  ;;  %v668_v20 = vld [vmem:[%s1657_s2 + $0x60] sm:$0xff]  ;;  %v667_v21 = vld [vmem:[%s1657_s2 + $0x58] sm:$0xff]  ;;  %v666_v22 = vld [vmem:[%s1657_s2 + $0x50] sm:$0xff] }
 0x12f   : > { %1204 = vmatpush3.msra.mxu0 %v671_v17  ;;  %1291 = vmatpush3.msra.mxu1 %v671_v17  ;;  %v665_v23 = vld [vmem:[%s1657_s2 + $0x48] sm:$0xff]  ;;  %v664_v24 = vld [vmem:[%s1657_s2 + $0x40] sm:$0xff]  ;;  %v663_v25 = vld [vmem:[%s1657_s2 + $0x38] sm:$0xff] }
 0x130   : > { %1205 = vmatprep.subr.mxu0 %v670_v18  ;;  %1276 = vmatprep.subr.mxu1 %v670_v18  ;;  %v662_v26 = vld [vmem:[%s1657_s2 + $0x30] sm:$0xff]  ;;  %v661_v27 = vld [vmem:[%s1657_s2 + $0x28] sm:$0xff]  ;;  %v660_v28 = vld [vmem:[%s1657_s2 + $0x20] sm:$0xff] }
 0x131   : > { %1206 = vmatpush3.msra.mxu0 %v670_v18  ;;  %1292 = vmatpush3.msra.mxu1 %v670_v18  ;;  %v659_v29 = vld [vmem:[%s1657_s2 + $0x18] sm:$0xff]  ;;  %v658_v30 = vld [vmem:[%s1657_s2 + $0x10] sm:$0xff]  ;;  %v657_v31 = vld [vmem:[%s1657_s2 + $0x8] sm:$0xff] }
 0x132   : > { %1207 = vmatprep.subr.mxu0 %v669_v19  ;;  %1277 = vmatprep.subr.mxu1 %v669_v19  ;;  %v656_v32 = vld [vmem:[%s1657_s2] sm:$0xff]  ;;  %v640_v33 = vld [vmem:[#allocation2 + $0x30] sm:$0xff]  ;;  %v642_v37 = vld [vmem:[#allocation2 + $0x58] sm:$0xff] }
 0x133   : > { %1208 = vmatpush3.msra.mxu0 %v669_v19  ;;  %1293 = vmatpush3.msra.mxu1 %v669_v19  ;;  %v648_v34 = vld [vmem:[#allocation2 + $0x40] sm:$0xff]  ;;  %v650_v38 = vld [vmem:[#allocation2 + $0x10] sm:$0xff]  ;;  %v643_v39 = vld [vmem:[#allocation2 + $0x18] sm:$0xff] }
 0x134   : > { %1209 = vmatprep.subr.mxu0 %v668_v20  ;;  %1278 = vmatprep.subr.mxu1 %v668_v20  ;;  %v641_v35 = vld [vmem:[#allocation2] sm:$0xff]  ;;  %v651_v40 = vld [vmem:[#allocation2 + $0x38] sm:$0xff]  ;;  %v644_v41 = vld [vmem:[#allocation2 + $0x50] sm:$0xff] }
 0x135   : > { %1210 = vmatpush3.msra.mxu0 %v668_v20  ;;  %1294 = vmatpush3.msra.mxu1 %v668_v20  ;;  %v649_v36 = vld [vmem:[#allocation2 + $0x20] sm:$0xff]  ;;  %v645_v43 = vld [vmem:[#allocation2 + $0x68] sm:$0xff]  ;;  %v653_v44 = vld [vmem:[#allocation2 + $0x70] sm:$0xff] }
 0x136   : > { %1211 = vmatprep.subr.mxu0 %v667_v21  ;;  %1279 = vmatprep.subr.mxu1 %v667_v21  ;;  %v652_v42 = vld [vmem:[#allocation2 + $0x60] sm:$0xff]  ;;  %v646_v45 = vld [vmem:[#allocation2 + $0x8] sm:$0xff]  ;;  %v654_v46 = vld [vmem:[#allocation2 + $0x78] sm:$0xff] }
 0x137   : > { %1212 = vmatpush3.msra.mxu0 %v667_v21  ;;  %1295 = vmatpush3.msra.mxu1 %v667_v21  ;;  %v647_v47 = vld [vmem:[#allocation2 + $0x48] sm:$0xff]  ;;  %v1040_v49 = vld [vmem:[%s1658_s3] ss:$0 sm:$0xff] }
 0x138   : > { %1213 = vmatprep.subr.mxu0 %v666_v22  ;;  %1280 = vmatprep.subr.mxu1 %v666_v22  ;;  %v655_v48 = vld [vmem:[#allocation2 + $0x28] sm:$0xff] }
 0x139   : > { %1214 = vmatpush3.msra.mxu0 %v666_v22  ;;  %1296 = vmatpush3.msra.mxu1 %v666_v22 }
 0x13a   : > { %1215 = vmatprep.subr.mxu0 %v665_v23  ;;  %1281 = vmatprep.subr.mxu1 %v665_v23 }
 0x13b   : > { %1216 = vmatpush3.msra.mxu0 %v665_v23  ;;  %1297 = vmatpush3.msra.mxu1 %v665_v23 }
 0x13c   : > { %1217 = vmatprep.subr.mxu0 %v664_v24  ;;  %1282 = vmatprep.subr.mxu1 %v664_v24 }
 0x13d   : > { %1218 = vmatpush3.msra.mxu0 %v664_v24  ;;  %1298 = vmatpush3.msra.mxu1 %v664_v24 }
 0x13e   : > { %1219 = vmatprep.subr.mxu0 %v663_v25  ;;  %1283 = vmatprep.subr.mxu1 %v663_v25 }
 0x13f   : > { %1220 = vmatpush3.msra.mxu0 %v663_v25  ;;  %1299 = vmatpush3.msra.mxu1 %v663_v25 }
 0x140   : > { %1221 = vmatprep.subr.mxu0 %v662_v26  ;;  %1284 = vmatprep.subr.mxu1 %v662_v26 }
 0x141   : > { %1222 = vmatpush3.msra.mxu0 %v662_v26  ;;  %1300 = vmatpush3.msra.mxu1 %v662_v26 }
 0x142   : > { %1223 = vmatprep.subr.mxu0 %v661_v27  ;;  %1285 = vmatprep.subr.mxu1 %v661_v27 }
 0x143   : > { %1224 = vmatpush3.msra.mxu0 %v661_v27  ;;  %1301 = vmatpush3.msra.mxu1 %v661_v27 }
 0x144   : > { %1225 = vmatprep.subr.mxu0 %v660_v28  ;;  %1286 = vmatprep.subr.mxu1 %v660_v28 }
 0x145   : > { %1226 = vmatpush3.msra.mxu0 %v660_v28  ;;  %1302 = vmatpush3.msra.mxu1 %v660_v28 }
 0x146   : > { %1227 = vmatprep.subr.mxu0 %v659_v29  ;;  %1287 = vmatprep.subr.mxu1 %v659_v29 }
 0x147   : > { %1228 = vmatpush3.msra.mxu0 %v659_v29  ;;  %1303 = vmatpush3.msra.mxu1 %v659_v29 }
 0x148   : > { %1229 = vmatprep.subr.mxu0 %v658_v30  ;;  %1288 = vmatprep.subr.mxu1 %v658_v30 }
 0x149   : > { %1230 = vmatpush3.msra.mxu0 %v658_v30  ;;  %1304 = vmatpush3.msra.mxu1 %v658_v30 }
 0x14a   : > { %1231 = vmatprep.subr.mxu0 %v657_v31  ;;  %1289 = vmatprep.subr.mxu1 %v657_v31 }
 0x14b   : > { %1232 = vmatpush3.msra.mxu0 %v657_v31  ;;  %1305 = vmatpush3.msra.mxu1 %v657_v31 }
 0x14c   : > { %1233 = vmatprep.subr.mxu0 %v656_v32  ;;  %1290 = vmatprep.subr.mxu1 %v656_v32 }
 0x14d   : > { %1234 = vmatpush3.msra.mxu0 %v656_v32  ;;  %1306 = vmatpush3.msra.mxu1 %v656_v32 }
 0x14e   : > { %1235 = vmatprep.mubr.f32.mxu0 %v640_v33  ;;  %1247 = vmatprep.mubr.f32.mxu1 %v648_v34 }
 0x14f   : > { %1236 = vmatmul.mubr.f32.vlgmr.msra.gmra.mxu0 %v641_v35  ;;  %1248 = vmatmul.mubr.f32.vlgmr.msra.gmra.mxu1 %v649_v36 }
 0x150   : > { %1238 = vmatprep.mubr.f32.mxu0 %v642_v37  ;;  %1250 = vmatprep.mubr.f32.mxu1 %v650_v38 }
 0x153   : > { %1239 = vmatmul.mubr.f32.gmra.mxu0 %v643_v39  ;;  %1251 = vmatmul.mubr.f32.gmra.mxu1 %v651_v40 }
 0x154   : > { %1241 = vmatprep.mubr.f32.mxu0 %v644_v41  ;;  %1253 = vmatprep.mubr.f32.mxu1 %v652_v42 }
 0x157   : > { %1242 = vmatmul.mubr.f32.gmra.mxu0 %v645_v43  ;;  %1254 = vmatmul.mubr.f32.gmra.mxu1 %v653_v44 }
 0x158   : > { %1244 = vmatprep.mubr.f32.mxu0 %v646_v45  ;;  %1256 = vmatprep.mubr.f32.mxu1 %v654_v46 }
 0x15b   : > { %1245 = vmatmul.mubr.f32.gmra.mxu0 %v647_v47  ;;  %1257 = vmatmul.mubr.f32.gmra.mxu1 %v655_v48 }
 0x20f   : > { %v1237_v50 = vpop.f32.mrf.mxu0  ;;  %v1249_v51 = vpop.f32.mrf.mxu1 }
 0x210   : > { %v751_v52 = vadd.f32 %v1237_v50, %v1040_v49  ;;  %v791_v53 = vadd.f32 %v1249_v51, %v1040_v49 }
 0x211   : > { %v745_v54 = vpop.f32.mrf.mxu0  ;;  %v785_v55 = vpop.f32.mrf.mxu1 }
 0x212   : > { %v746_v56 = vadd.f32 %v1040_v49, %v745_v54  ;;  %v786_v57 = vadd.f32 %v1040_v49, %v785_v55  ;;  %v825_v60 = vmax.f32 %v751_v52, 0.0  ;;  %v833_v61 = vmax.f32 %v791_v53, 0.0 }
 0x213   : > { %v1240_v58 = vpop.f32.mrf.mxu0  ;;  %v1252_v59 = vpop.f32.mrf.mxu1 }
 0x214   : > { %v824_v62 = vmax.f32 %v746_v56, 0.0  ;;  %v832_v63 = vmax.f32 %v786_v57, 0.0  ;;  %v761_v0 = vadd.f32 %v1240_v58, %v1040_v49  ;;  %v801_v1 = vadd.f32 %v1252_v59, %v1040_v49 }
 0x215   : > { %v755_v2 = vpop.f32.mrf.mxu0  ;;  %v795_v3 = vpop.f32.mrf.mxu1 }
 0x216   : > { %v1079_v4 = vpack.c.bf16 %v825_v60, %v824_v62  ;;  %v1099_v5 = vpack.c.bf16 %v833_v61, %v832_v63  ;;  %v756_v6 = vadd.f32 %v1040_v49, %v755_v2  ;;  %v796_v7 = vadd.f32 %v1040_v49, %v795_v3 }
 0x217   : > { %v1243_v8 = vpop.f32.mrf.mxu0  ;;  %v1255_v9 = vpop.f32.mrf.mxu1  ;;  %v827_v12 = vmax.f32 %v761_v0, 0.0  ;;  %v835_v13 = vmax.f32 %v801_v1, 0.0 }
 0x218   : > { %1080 = vst [vmem:[%s1553_s7] sm:$0xff] %v1079_v4   ;;  %1119 = vst [vmem:[%s1553_s7 + $0x20] sm:$0xff] %v1099_v5   ;;  %v771_v10 = vadd.f32 %v1243_v8, %v1040_v49  ;;  %v811_v11 = vadd.f32 %v1255_v9, %v1040_v49  ;;  %v826_v14 = vmax.f32 %v756_v6, 0.0  ;;  %v834_v15 = vmax.f32 %v796_v7, 0.0 }
 0x219   : > { %v765_v16 = vpop.f32.mrf.mxu0  ;;  %v805_v17 = vpop.f32.mrf.mxu1 }
 0x21a   : > { %v766_v18 = vadd.f32 %v1040_v49, %v765_v16  ;;  %v806_v19 = vadd.f32 %v1040_v49, %v805_v17  ;;  %v1084_v20 = vpack.c.bf16 %v827_v12, %v826_v14  ;;  %v1104_v21 = vpack.c.bf16 %v835_v13, %v834_v15 }
 0x21b   : > { %v1246_v22 = vpop.f32.mrf.mxu0  ;;  %v1258_v23 = vpop.f32.mrf.mxu1  ;;  %v829_v24 = vmax.f32 %v771_v10, 0.0  ;;  %v837_v25 = vmax.f32 %v811_v11, 0.0 }
 0x21c   : > { %v828_v26 = vmax.f32 %v766_v18, 0.0  ;;  %v836_v27 = vmax.f32 %v806_v19, 0.0  ;;  %1116 = vst [vmem:[%s1553_s7 + $0x8] sm:$0xff] %v1084_v20   ;;  %1120 = vst [vmem:[%s1553_s7 + $0x28] sm:$0xff] %v1104_v21   ;;  %v781_v28 = vadd.f32 %v1246_v22, %v1040_v49  ;;  %v821_v29 = vadd.f32 %v1258_v23, %v1040_v49 }
 0x21d   : > { %v775_v30 = vpop.f32.mrf.mxu0  ;;  %v815_v31 = vpop.f32.mrf.mxu1 }
 0x21e   : > { %v1089_v32 = vpack.c.bf16 %v829_v24, %v828_v26  ;;  %v1109_v33 = vpack.c.bf16 %v837_v25, %v836_v27  ;;  %v776_v34 = vadd.f32 %v1040_v49, %v775_v30  ;;  %v816_v35 = vadd.f32 %v1040_v49, %v815_v31 }
 0x21f   : > { %v831_v36 = vmax.f32 %v781_v28, 0.0  ;;  %v839_v37 = vmax.f32 %v821_v29, 0.0 }
 0x220   : > { %1117 = vst [vmem:[%s1553_s7 + $0x10] sm:$0xff] %v1089_v32   ;;  %1121 = vst [vmem:[%s1553_s7 + $0x30] sm:$0xff] %v1109_v33   ;;  %v830_v38 = vmax.f32 %v776_v34, 0.0  ;;  %v838_v39 = vmax.f32 %v816_v35, 0.0 }
 0x222   : > { %v1094_v40 = vpack.c.bf16 %v831_v36, %v830_v38  ;;  %v1114_v41 = vpack.c.bf16 %v839_v37, %v838_v39 }
 0x224   : > { %1118 = vst [vmem:[%s1553_s7 + $0x18] sm:$0xff] %v1094_v40   ;;  %1122 = vst [vmem:[%s1553_s7 + $0x38] sm:$0xff] %v1114_v41  }
 0x225 PF: > { %s14_s21 = sadd.s32 1, %s1434_s21   ;;  %s1660_s15 = smov %s1414_s16 }
 0x226   : > { %p11_p0 = scmp.ge.s32.totalorder %s14_s21, 6   ;;  %s1661_s16 = smov %s1513_s28 }
 0x227   : > { %s1662_s17 = smov %s1426_s19  ;;  %s1663_s18 = smov %s1430_s20 }
 0x228   : > { %s1664_s19 = smov %s1667_s22  ;;  %s1665_s20 = smov %s1671_s23 }
 0x229   :  { %13 = sbr.rel (!%p11_p0) target bundleno = 4 (0x4), region = 123 }

// kernel: gcn_forward.3
= control target key start
LH: loop header
LB: loop body
LE: loop exit
PB: predicated region body
PF: predicated region fallthrough
CT: control target
= control target key end

     0   :  { %12 = vsyncpa [#allocation6], 0  ;;  %s1702_s24 = smov 0   ;;  %s1704_s25 = smov 0   ;;  %s1987_s0 = inlined_call_operand.vmem [shape: bf16[256,256], index: 0, kind: input, shape index: {}]   ;;  %s1988_s1 = inlined_call_operand.vmem [shape: bf16[256,128], index: 1, kind: input, shape index: {}]   ;;  %s1989_s2 = inlined_call_operand.vmem [shape: f32[3,256], index: 2, kind: input, shape index: {}]   ;;  %s1990_s3 = inlined_call_operand.vmem [shape: f32[128,128], index: 3, kind: input, shape index: {}]   ;;  %s1991_s4 = inlined_call_operand.vmem [shape: f32[1,128], index: 4, kind: input, shape index: {}]   ;;  %s1992_s5 = inlined_call_operand.vmem [shape: f32[128,128], index: 5, kind: input, shape index: {}]   ;;  %s1993_s6 = inlined_call_operand.vmem [shape: f32[1,128], index: 6, kind: input, shape index: {}]   ;;  %s1994_s7 = inlined_call_operand.hbm [shape: f32[3,128], index: 7, kind: output, shape index: {}]  }
   0x1   :  { %s1706_s26 = smov 0   ;;  %s1708_s27 = smov 0  }
   0x2   :  { %s1710_s28 = smov 0   ;;  %s1712_s29 = smov 0  }
   0x3   :  { %s1714_s30 = smov 0  }
   0x4 LB: > { %s1193_s8 = sadd.s32 4294967295, %s1653_s30   ;;  %s27_s9 = sadd.s32 1, %s1645_s28  ;;  %s1653_s30 = sphi %s1714_s30, %s18_s30   ;;  %s1649_s29 = sphi %s1712_s29, %s2001_s29   ;;  %s1645_s28 = sphi %s1710_s28, %s2000_s28   ;;  %s1641_s27 = sphi %s1708_s27, %s1999_s27   ;;  %s1637_s26 = sphi %s1706_s26, %s1998_s26   ;;  %s1633_s25 = sphi %s1704_s25, %s1997_s25   ;;  %s1629_s24 = sphi %s1702_s24, %s1996_s24  }
   0x5   : > { %p28_p0 = scmp.ge.s32.totalorder %s27_s9, 2  ;;  %s30_s10 = sadd.s32 1, %s1649_s29 }
   0x6   : > { %p46_p1 = scmp.ne.s32.totalorder %s1633_s25, %s1629_s24  ;;  %p47_p2 = scmp.eq.s32.totalorder %s1653_s30, 0 }
   0x7   : > { %s2003_s9 = smov (%p28_p0, %s27_s9), 0  ;;  %s2005_s10 = smov (!%p28_p0, %s30_s10), %s1649_s29 }
   0x8   : > { %p32_p3 = scmp.ge.s32.totalorder %s2005_s10, 2  ;;  %s35_s11 = ssub.s32 %s1645_s28, %s2003_s9 }
   0x9   : > { %p48_p4 = por %p47_p2, %p46_p1  ;;  %s39_s14 = sadd.s32 1, %s1633_s25 }
   0xa   : > { %s2007_s10 = smov (%p32_p3, %s2005_s10), 0  ;;  %p1195_p6 = scmp.ge.s32.totalorder %s1653_s30, 4 }
   0xb   : > { %s34_s12 = ssub.s32 %s1649_s29, %s2007_s10 }
   0xc   : > { %s36_s13 = sor.u32 %s35_s11, %s34_s12  ;;  %241 = sbr.rel (%p1195_p6) target bundleno = 33 (0x21), region = 32 }
   0xd   : > { %p37_p5 = scmp.eq.s32.totalorder %s36_s13, 0 }
   0xf   : > { %s1754_s15 = scalar_select %p37_p5, %s1633_s25, %s39_s14  }
  0x11   : > { %244 = sbr.rel (!%p48_p4) target bundleno = 33 (0x21), region = 36  ;;  %s246_s16 = sand.u32 (%p48_p4), 1, %s1633_s25  }
  0x12   : > { %s1229_s17 = sshll.u32 (%p48_p4), %s1649_s29, 5  ;;  %s1196_s18 = sshll.u32 (%p48_p4), %s246_s16, 6 }
  0x13   : > { %s251_s19 = sadd.s32 (%p48_p4), %s1645_s28, %s1229_s17  ;;  %s248_s11 = scalar_lea.vmem (%p48_p4), [#allocation4], %s1196_s18 }
  0x14   : > { %s1199_s20 = sshll.u32 (%p48_p4), %s251_s19, 2 }
  0x15   : > { %s1763_s23 = scalar_lea.vmem (%p48_p4), %s1987_s0, %s1199_s20 }
  0x16   : > { %v270_v0 = vld [vmem:[%s1763_s23] sm:$0xf]  ;;  %v272_v1 = vld [vmem:[%s1763_s23 + $0x8] sm:$0xf]  ;;  %v274_v2 = vld [vmem:[%s1763_s23 + $0x10] sm:$0xf] }
  0x17   : > { %271 = vst [vmem:[%s248_s11] sm:$0xf] %v270_v0  ;;  %273 = vst [vmem:[%s248_s11 + $0x4] sm:$0xf] %v272_v1  ;;  %v276_v3 = vld [vmem:[%s1763_s23 + $0x18] sm:$0xf] }
  0x18   : > { %275 = vst [vmem:[%s248_s11 + $0x8] sm:$0xf] %v274_v2  ;;  %v278_v4 = vld [vmem:[%s1763_s23 + $0x20] sm:$0xf]  ;;  %v280_v5 = vld [vmem:[%s1763_s23 + $0x28] sm:$0xf] }
  0x19   : > { %277 = vst [vmem:[%s248_s11 + $0xc] sm:$0xf] %v276_v3  ;;  %279 = vst [vmem:[%s248_s11 + $0x10] sm:$0xf] %v278_v4  ;;  %v282_v6 = vld [vmem:[%s1763_s23 + $0x30] sm:$0xf] }
  0x1a   : > { %281 = vst [vmem:[%s248_s11 + $0x14] sm:$0xf] %v280_v5  ;;  %v284_v7 = vld [vmem:[%s1763_s23 + $0x38] sm:$0xf]  ;;  %v286_v8 = vld [vmem:[%s1763_s23 + $0x40] sm:$0xf] }
  0x1b   : > { %283 = vst [vmem:[%s248_s11 + $0x18] sm:$0xf] %v282_v6  ;;  %285 = vst [vmem:[%s248_s11 + $0x1c] sm:$0xf] %v284_v7  ;;  %v288_v9 = vld [vmem:[%s1763_s23 + $0x48] sm:$0xf] }
  0x1c   : > { %287 = vst [vmem:[%s248_s11 + $0x20] sm:$0xf] %v286_v8  ;;  %v290_v10 = vld [vmem:[%s1763_s23 + $0x50] sm:$0xf]  ;;  %v292_v11 = vld [vmem:[%s1763_s23 + $0x58] sm:$0xf] }
  0x1d   : > { %289 = vst [vmem:[%s248_s11 + $0x24] sm:$0xf] %v288_v9  ;;  %291 = vst [vmem:[%s248_s11 + $0x28] sm:$0xf] %v290_v10  ;;  %v294_v12 = vld [vmem:[%s1763_s23 + $0x60] sm:$0xf] }
  0x1e   : > { %293 = vst [vmem:[%s248_s11 + $0x2c] sm:$0xf] %v292_v11  ;;  %v296_v13 = vld [vmem:[%s1763_s23 + $0x68] sm:$0xf]  ;;  %v298_v14 = vld [vmem:[%s1763_s23 + $0x70] sm:$0xf] }
  0x1f   : > { %295 = vst [vmem:[%s248_s11 + $0x30] sm:$0xf] %v294_v12  ;;  %297 = vst [vmem:[%s248_s11 + $0x34] sm:$0xf] %v296_v13  ;;  %v300_v15 = vld [vmem:[%s1763_s23 + $0x78] sm:$0xf] }
  0x20   : > { %299 = vst [vmem:[%s248_s11 + $0x38] sm:$0xf] %v298_v14  ;;  %301 = vst [vmem:[%s248_s11 + $0x3c] sm:$0xf] %v300_v15 }
  0x21 PF: > { %p1200_p7 = scmp.ge.s32.totalorder %s1653_s30, 1  ;;  %p372_p8 = scmp.lt.s32.totalorder %s1653_s30, 5 }
  0x23   : > { %p373_p9 = pnand %p1200_p7, %p372_p8 }
  0x24   : > { %s379_s12 = sand.u32 (!%p373_p9), 1, %s1629_s24   ;;  %s1202_s13 = sshll.u32 (!%p373_p9), %s1637_s26, 4 }
  0x25   : > { %376 = sbr.rel (%p373_p9) target bundleno = 1048 (0x418), region = 85  ;;  %s1201_s14 = sshll.u32 (!%p373_p9), %s379_s12, 6 }
  0x26   : > { %p416_p10 = scmp.lt.s32.totalorder (!%p373_p9), %s1202_s13, 31  ;;  %p421_p11 = scmp.lt.s32.totalorder (!%p373_p9), %s1641_s27, 1 }
  0x27   : > { %p426_p12 = scmp.eq.s32.totalorder (!%p373_p9), %s1641_s27, 0  ;;  %p427_p13 = scmp.eq.s32.totalorder (!%p373_p9), %s1637_s26, 0 }
  0x28   : > { %s1799_s24 = scalar_lea.vmem (!%p373_p9), [#allocation4], %s1201_s14 }
  0x29   : > { %p428_p0 = pnand (!%p373_p9), %p427_p13, %p426_p12 }
  0x2a   : > { %s2009_s13 = smov (!%p416_p10, %s1202_s13), 31 }
  0x2b   : > { %s422_s16 = scalar_select %p421_p11, %s1641_s27, 1 }
  0x2c   : > { %s1203_s17 = sshll.u32 %s2009_s13, 2  ;;  %431 = sbr.rel (%p428_p0) target bundleno = 51 (0x33), region = 93 }
  0x2d   : > { %s1791_s20 = scalar_lea.vmem %s1988_s1, %s1203_s17  ;;  %s1204_s21 = sshll.u32 %s422_s16, 2 }
  0x2e   : > { %s1796_s11 = scalar_lea.vmem %s1989_s2, %s1204_s21 }
  0x31   : > { %v1655_v16 = vmov 0.0  }
  0x32   : > { %432 = vst [vmem:[#allocation3] sm:$0x7] %v1655_v16 }
  0x33 PF: > { %p1205_p1 = scmp.ne.s32.totalorder %s1637_s26, 0 }
  0x35   : > { %435 = sbr.rel (%p1205_p1) target bundleno = 67 (0x43), region = 97 }
  0x3a   : > { %v1656_v17 = vmov 0.0  }
  0x3b   : > { %436 = vst [vmem:[#allocation2 + $0x30] sm:$0xff] %v1656_v17  ;;  %437 = vst [vmem:[#allocation2] sm:$0xff] %v1656_v17 }
  0x3c   : > { %438 = vst [vmem:[#allocation2 + $0x58] sm:$0xff] %v1656_v17  ;;  %439 = vst [vmem:[#allocation2 + $0x18] sm:$0xff] %v1656_v17 }
  0x3d   : > { %440 = vst [vmem:[#allocation2 + $0x50] sm:$0xff] %v1656_v17  ;;  %441 = vst [vmem:[#allocation2 + $0x68] sm:$0xff] %v1656_v17 }
  0x3e   : > { %442 = vst [vmem:[#allocation2 + $0x8] sm:$0xff] %v1656_v17  ;;  %443 = vst [vmem:[#allocation2 + $0x48] sm:$0xff] %v1656_v17 }
  0x3f   : > { %444 = vst [vmem:[#allocation2 + $0x40] sm:$0xff] %v1656_v17  ;;  %445 = vst [vmem:[#allocation2 + $0x20] sm:$0xff] %v1656_v17 }
  0x40   : > { %446 = vst [vmem:[#allocation2 + $0x10] sm:$0xff] %v1656_v17  ;;  %447 = vst [vmem:[#allocation2 + $0x38] sm:$0xff] %v1656_v17 }
  0x41   : > { %448 = vst [vmem:[#allocation2 + $0x60] sm:$0xff] %v1656_v17  ;;  %449 = vst [vmem:[#allocation2 + $0x70] sm:$0xff] %v1656_v17 }
  0x42   : > { %450 = vst [vmem:[#allocation2 + $0x78] sm:$0xff] %v1656_v17  ;;  %451 = vst [vmem:[#allocation2 + $0x28] sm:$0xff] %v1656_v17 }
  0x43 PF: > { %v1555_v18 = vld [vmem:[%s1791_s20 + $0x38] sm:$0xff]   ;;  %v1556_v19 = vld [vmem:[%s1791_s20 + $0x30] sm:$0xff]   ;;  %v1557_v20 = vld [vmem:[%s1791_s20 + $0x28] sm:$0xff]   ;;  %p725_p2 = scmp.eq.s32.totalorder %s1637_s26, 1  ;;  %p1222_p3 = scmp.ne.s32.totalorder %s1637_s26, 1 }
  0x44   : > { %1312 = vmatprep.subr.bf16.mxu0 %v1555_v18  ;;  %1470 = vmatprep.subr.bf16.mxu1 %v1555_v18  ;;  %v1558_v21 = vld [vmem:[%s1791_s20 + $0x20] sm:$0xff]   ;;  %v1559_v24 = vld [vmem:[%s1791_s20 + $0x18] sm:$0xff]   ;;  %v1560_v25 = vld [vmem:[%s1791_s20 + $0x10] sm:$0xff]  }
  0x45   : > { %1313 = vmatpush3.bf16.msra.mxu0 %v1555_v18  ;;  %1478 = vmatpush3.bf16.msra.mxu1 %v1555_v18  ;;  %v1563_v22 = vld [vmem:[%s1799_s24] sm:$0xff]   ;;  %v1565_v28 = vld [vmem:[%s1799_s24 + $0x8] sm:$0xff]   ;;  %v1567_v30 = vld [vmem:[%s1799_s24 + $0x10] sm:$0xff]  }
  0x46   : > { %1314 = vmatprep.subr.bf16.mxu0 %v1556_v19  ;;  %1471 = vmatprep.subr.bf16.mxu1 %v1556_v19  ;;  %v1564_v23 = vld [vmem:[%s1799_s24 + $0x20] sm:$0xff]   ;;  %v1566_v29 = vld [vmem:[%s1799_s24 + $0x28] sm:$0xff]   ;;  %v1568_v31 = vld [vmem:[%s1799_s24 + $0x30] sm:$0xff]  }
  0x47   : > { %1328 = vmatprep.mubr.bf16.mxu0 %v1563_v22  ;;  %1336 = vmatprep.mubr.bf16.mxu1 %v1564_v23  ;;  %v1561_v26 = vld [vmem:[%s1791_s20 + $0x8] sm:$0xff]   ;;  %v1562_v27 = vld [vmem:[%s1791_s20] sm:$0xff]   ;;  %v454_v34 = vld [vmem:[#allocation2 + $0x58] sm:$0xff] }
  0x48   : > { %v1569_v32 = vld [vmem:[%s1799_s24 + $0x18] sm:$0xff]   ;;  %v462_v35 = vld [vmem:[#allocation2 + $0x10] sm:$0xff]  ;;  %v458_v56 = vld [vmem:[#allocation2 + $0x8] sm:$0xff] }
  0x49   : > { %1315 = vmatpush3.bf16.msra.mxu0 %v1556_v19  ;;  %1479 = vmatpush3.bf16.msra.mxu1 %v1556_v19  ;;  %v1570_v33 = vld [vmem:[%s1799_s24 + $0x38] sm:$0xff]   ;;  %v452_v38 = vld [vmem:[#allocation2 + $0x30] sm:$0xff]  ;;  %v459_v4 = vld [vmem:[#allocation2 + $0x48] sm:$0xff] }
  0x4a   : > { %1316 = vmatprep.subr.bf16.mxu0 %v1557_v20  ;;  %1472 = vmatprep.subr.bf16.mxu1 %v1557_v20  ;;  %v460_v39 = vld [vmem:[#allocation2 + $0x40] sm:$0xff]  ;;  %v455_v44 = vld [vmem:[#allocation2 + $0x18] sm:$0xff]  ;;  %v456_v62 = vld [vmem:[#allocation2 + $0x50] sm:$0xff] }
  0x4b   : > { %v463_v45 = vld [vmem:[#allocation2 + $0x38] sm:$0xff]  ;;  %v453_v50 = vld [vmem:[#allocation2] sm:$0xff]  ;;  %v467_v5 = vld [vmem:[#allocation2 + $0x28] sm:$0xff] }
  0x4c   : > { %v461_v51 = vld [vmem:[#allocation2 + $0x20] sm:$0xff]  ;;  %v466_v57 = vld [vmem:[#allocation2 + $0x78] sm:$0xff]  ;;  %v457_v10 = vld [vmem:[#allocation2 + $0x68] sm:$0xff] }
  0x4d   : > { %1317 = vmatpush3.bf16.msra.mxu0 %v1557_v20  ;;  %1480 = vmatpush3.bf16.msra.mxu1 %v1557_v20  ;;  %v464_v63 = vld [vmem:[#allocation2 + $0x60] sm:$0xff]  ;;  %v465_v11 = vld [vmem:[#allocation2 + $0x70] sm:$0xff] }
  0x4e   : > { %1318 = vmatprep.subr.bf16.mxu0 %v1558_v21  ;;  %1473 = vmatprep.subr.bf16.mxu1 %v1558_v21 }
  0x51   : > { %1319 = vmatpush3.bf16.msra.mxu0 %v1558_v21  ;;  %1481 = vmatpush3.bf16.msra.mxu1 %v1558_v21 }
  0x52   : > { %1320 = vmatprep.subr.bf16.mxu0 %v1559_v24  ;;  %1474 = vmatprep.subr.bf16.mxu1 %v1559_v24 }
  0x55   : > { %1321 = vmatpush3.bf16.msra.mxu0 %v1559_v24  ;;  %1482 = vmatpush3.bf16.msra.mxu1 %v1559_v24 }
  0x56   : > { %1322 = vmatprep.subr.bf16.mxu0 %v1560_v25  ;;  %1475 = vmatprep.subr.bf16.mxu1 %v1560_v25 }
  0x59   : > { %1323 = vmatpush3.bf16.msra.mxu0 %v1560_v25  ;;  %1483 = vmatpush3.bf16.msra.mxu1 %v1560_v25 }
  0x5a   : > { %1324 = vmatprep.subr.bf16.mxu0 %v1561_v26  ;;  %1476 = vmatprep.subr.bf16.mxu1 %v1561_v26 }
  0x5d   : > { %1325 = vmatpush3.bf16.msra.mxu0 %v1561_v26  ;;  %1484 = vmatpush3.bf16.msra.mxu1 %v1561_v26 }
  0x5e   : > { %1326 = vmatprep.subr.bf16.mxu0 %v1562_v27  ;;  %1477 = vmatprep.subr.bf16.mxu1 %v1562_v27 }
  0x61   : > { %1327 = vmatpush3.bf16.msra.mxu0 %v1562_v27  ;;  %1485 = vmatpush3.bf16.msra.mxu1 %v1562_v27 }
  0x64   : > { %1329 = vmatmul.mubr.bf16.vlgmr.msra.gmra.mxu0 %v1565_v28  ;;  %1337 = vmatmul.mubr.bf16.vlgmr.msra.gmra.mxu1 %v1566_v29 }
  0x65   : > { %1332 = vmatprep.mubr.bf16.mxu0 %v1567_v30  ;;  %1340 = vmatprep.mubr.bf16.mxu1 %v1568_v31 }
  0x6c   : > { %1333 = vmatmul.mubr.bf16.gmra.mxu0 %v1569_v32  ;;  %1341 = vmatmul.mubr.bf16.gmra.mxu1 %v1570_v33 }
 0x124   : > { %v1330_v36 = vpop.f32.mrf.mxu0  ;;  %v1338_v37 = vpop.f32.mrf.mxu1 }
 0x125   : > { %v695_v40 = vadd.f32 %v1330_v36, %v454_v34  ;;  %v703_v41 = vadd.f32 %v1338_v37, %v462_v35 }
 0x126   : > { %v630_v42 = vpop.f32.mrf.mxu0  ;;  %v662_v43 = vpop.f32.mrf.mxu1 }
 0x127   : > { %711 = vst [vmem:[#allocation2 + $0x58] sm:$0xff] %v695_v40  ;;  %719 = vst [vmem:[#allocation2 + $0x10] sm:$0xff] %v703_v41  ;;  %v693_v46 = vadd.f32 %v630_v42, %v452_v38  ;;  %v701_v47 = vadd.f32 %v662_v43, %v460_v39 }
 0x128   : > { %v1331_v48 = vpop.f32.mrf.mxu0  ;;  %v1339_v49 = vpop.f32.mrf.mxu1 }
 0x129   : > { %709 = vst [vmem:[#allocation2 + $0x30] sm:$0xff] %v693_v46  ;;  %717 = vst [vmem:[#allocation2 + $0x40] sm:$0xff] %v701_v47  ;;  %v696_v52 = vadd.f32 %v1331_v48, %v455_v44  ;;  %v704_v53 = vadd.f32 %v1339_v49, %v463_v45 }
 0x12a   : > { %v633_v54 = vpop.f32.mrf.mxu0  ;;  %v665_v55 = vpop.f32.mrf.mxu1 }
 0x12b   : > { %712 = vst [vmem:[#allocation2 + $0x18] sm:$0xff] %v696_v52  ;;  %720 = vst [vmem:[#allocation2 + $0x38] sm:$0xff] %v704_v53  ;;  %v694_v58 = vadd.f32 %v633_v54, %v453_v50  ;;  %v702_v59 = vadd.f32 %v665_v55, %v461_v51 }
 0x12c   : > { %v1334_v60 = vpop.f32.mrf.mxu0  ;;  %v1342_v61 = vpop.f32.mrf.mxu1 }
 0x12d   : > { %710 = vst [vmem:[#allocation2] sm:$0xff] %v694_v58  ;;  %718 = vst [vmem:[#allocation2 + $0x20] sm:$0xff] %v702_v59  ;;  %v699_v0 = vadd.f32 %v1334_v60, %v458_v56  ;;  %v707_v1 = vadd.f32 %v1342_v61, %v466_v57 }
 0x12e   : > { %v646_v2 = vpop.f32.mrf.mxu0  ;;  %v678_v3 = vpop.f32.mrf.mxu1 }
 0x12f   : > { %715 = vst [vmem:[#allocation2 + $0x8] sm:$0xff] %v699_v0  ;;  %723 = vst [vmem:[#allocation2 + $0x78] sm:$0xff] %v707_v1  ;;  %v697_v6 = vadd.f32 %v646_v2, %v456_v62  ;;  %v705_v7 = vadd.f32 %v678_v3, %v464_v63 }
 0x130   : > { %v1335_v8 = vpop.f32.mrf.mxu0  ;;  %v1343_v9 = vpop.f32.mrf.mxu1 }
 0x131   : > { %713 = vst [vmem:[#allocation2 + $0x50] sm:$0xff] %v697_v6  ;;  %721 = vst [vmem:[#allocation2 + $0x60] sm:$0xff] %v705_v7  ;;  %v700_v12 = vadd.f32 %v1335_v8, %v459_v4  ;;  %v708_v13 = vadd.f32 %v1343_v9, %v467_v5  ;;  %728 = sbr.rel (%p1222_p3) target bundleno = 795 (0x31b), region = 101 }
 0x132   : > { %v649_v14 = vpop.f32.mrf.mxu0  ;;  %v681_v15 = vpop.f32.mrf.mxu1 }
 0x133   : > { %716 = vst [vmem:[#allocation2 + $0x48] sm:$0xff] %v700_v12  ;;  %724 = vst [vmem:[#allocation2 + $0x28] sm:$0xff] %v708_v13  ;;  %v698_v16 = vadd.f32 %v649_v14, %v457_v10  ;;  %v706_v17 = vadd.f32 %v681_v15, %v465_v11 }
 0x135   : > { %714 = vst [vmem:[#allocation2 + $0x68] sm:$0xff] %v698_v16  ;;  %722 = vst [vmem:[#allocation2 + $0x70] sm:$0xff] %v706_v17 }
 0x136   : > { %v760_v18 = vld [vmem:[%s1990_s3 + $0x78] sm:$0xff]  ;;  %v759_v19 = vld [vmem:[%s1990_s3 + $0x70] sm:$0xff]  ;;  %v758_v20 = vld [vmem:[%s1990_s3 + $0x68] sm:$0xff]  ;;  %v1657_v50 = vmov 0.0   ;;  %vm1658_vm0 = vmmov 0  }
 0x137   : > { %1344 = vmatprep.subr.mxu0 %v760_v18  ;;  %v757_v21 = vld [vmem:[%s1990_s3 + $0x60] sm:$0xff]  ;;  %v729_v22 = vld [vmem:[#allocation2 + $0x30] sm:$0xff]  ;;  %v756_v23 = vld [vmem:[%s1990_s3 + $0x58] sm:$0xff]  ;;  %1400 = vmatprep.subr.mxu1 %v1657_v50 }
 0x138   : > { %1345 = vmatpush3.msra.mxu0 %v760_v18  ;;  %1376 = vmatprep.mubr.f32.mxu0 %v729_v22  ;;  %v755_v24 = vld [vmem:[%s1990_s3 + $0x50] sm:$0xff]  ;;  %v754_v25 = vld [vmem:[%s1990_s3 + $0x48] sm:$0xff]  ;;  %v753_v26 = vld [vmem:[%s1990_s3 + $0x40] sm:$0xff] }
 0x139   : > { %1346 = vmatprep.subr.mxu0 %v759_v19  ;;  %v752_v27 = vld [vmem:[%s1990_s3 + $0x38] sm:$0xff]  ;;  %v751_v28 = vld [vmem:[%s1990_s3 + $0x30] sm:$0xff]  ;;  %v750_v29 = vld [vmem:[%s1990_s3 + $0x28] sm:$0xff]  ;;  %1432 = vmatprep.mubr.msk.f32.mxu1 %vm1658_vm0, %v1657_v50 }
 0x13a   : > { %1347 = vmatpush3.msra.mxu0 %v759_v19  ;;  %v749_v30 = vld [vmem:[%s1990_s3 + $0x20] sm:$0xff]  ;;  %v748_v31 = vld [vmem:[%s1990_s3 + $0x18] sm:$0xff]  ;;  %v747_v32 = vld [vmem:[%s1990_s3 + $0x10] sm:$0xff] }
 0x13b   : > { %1348 = vmatprep.subr.mxu0 %v758_v20  ;;  %v746_v33 = vld [vmem:[%s1990_s3 + $0x8] sm:$0xff]  ;;  %v745_v34 = vld [vmem:[%s1990_s3] sm:$0xff]  ;;  %v731_v36 = vld [vmem:[#allocation2 + $0x58] sm:$0xff] }
 0x13c   : > { %1349 = vmatpush3.msra.mxu0 %v758_v20  ;;  %v730_v35 = vld [vmem:[#allocation2] sm:$0xff]  ;;  %v732_v37 = vld [vmem:[#allocation2 + $0x18] sm:$0xff]  ;;  %v733_v38 = vld [vmem:[#allocation2 + $0x50] sm:$0xff] }
 0x13d   : > { %1350 = vmatprep.subr.mxu0 %v757_v21  ;;  %v734_v39 = vld [vmem:[#allocation2 + $0x68] sm:$0xff]  ;;  %v737_v42 = vld [vmem:[#allocation2 + $0x40] sm:$0xff]  ;;  %v739_v44 = vld [vmem:[#allocation2 + $0x10] sm:$0xff] }
 0x13e   : > { %1351 = vmatpush3.msra.mxu0 %v757_v21  ;;  %v735_v40 = vld [vmem:[#allocation2 + $0x8] sm:$0xff]  ;;  %v738_v43 = vld [vmem:[#allocation2 + $0x20] sm:$0xff]  ;;  %v740_v45 = vld [vmem:[#allocation2 + $0x38] sm:$0xff] }
 0x13f   : > { %1352 = vmatprep.subr.mxu0 %v756_v23  ;;  %v736_v41 = vld [vmem:[#allocation2 + $0x48] sm:$0xff]  ;;  %v741_v46 = vld [vmem:[#allocation2 + $0x60] sm:$0xff]  ;;  %v742_v47 = vld [vmem:[#allocation2 + $0x70] sm:$0xff] }
 0x140   : > { %1353 = vmatpush3.msra.mxu0 %v756_v23  ;;  %v743_v48 = vld [vmem:[#allocation2 + $0x78] sm:$0xff]  ;;  %v744_v49 = vld [vmem:[#allocation2 + $0x28] sm:$0xff]  ;;  %v1223_v1 = vld [vmem:[%s1991_s4] ss:$0 sm:$0xff] }
 0x141   : > { %1354 = vmatprep.subr.mxu0 %v755_v24 }
 0x142   : > { %1355 = vmatpush3.msra.mxu0 %v755_v24 }
 0x143   : > { %1356 = vmatprep.subr.mxu0 %v754_v25 }
 0x144   : > { %1357 = vmatpush3.msra.mxu0 %v754_v25 }
 0x145   : > { %1358 = vmatprep.subr.mxu0 %v753_v26 }
 0x146   : > { %1359 = vmatpush3.msra.mxu0 %v753_v26 }
 0x147   : > { %1360 = vmatprep.subr.mxu0 %v752_v27 }
 0x148   : > { %1361 = vmatpush3.msra.mxu0 %v752_v27 }
 0x149   : > { %1362 = vmatprep.subr.mxu0 %v751_v28 }
 0x14a   : > { %1363 = vmatpush3.msra.mxu0 %v751_v28 }
 0x14b   : > { %1364 = vmatprep.subr.mxu0 %v750_v29 }
 0x14c   : > { %1365 = vmatpush3.msra.mxu0 %v750_v29 }
 0x14d   : > { %1366 = vmatprep.subr.mxu0 %v749_v30 }
 0x14e   : > { %1367 = vmatpush3.msra.mxu0 %v749_v30 }
 0x14f   : > { %1368 = vmatprep.subr.mxu0 %v748_v31 }
 0x150   : > { %1369 = vmatpush3.msra.mxu0 %v748_v31 }
 0x151   : > { %1370 = vmatprep.subr.mxu0 %v747_v32 }
 0x152   : > { %1371 = vmatpush3.msra.mxu0 %v747_v32 }
 0x153   : > { %1372 = vmatprep.subr.mxu0 %v746_v33 }
 0x154   : > { %1373 = vmatpush3.msra.mxu0 %v746_v33 }
 0x155   : > { %1374 = vmatprep.subr.mxu0 %v745_v34 }
 0x156   : > { %1375 = vmatpush3.msra.mxu0 %v745_v34 }
 0x157   : > { %1377 = vmatmul.mubr.f32.vlgmr.msra.gmra.mxu0 %v730_v35 }
 0x158   : > { %1379 = vmatprep.mubr.f32.mxu0 %v731_v36  ;;  %v930_v36 = vld [vmem:[%s1796_s11] sm:$0x7] }
 0x15b   : > { %1380 = vmatmul.mubr.f32.gmra.mxu0 %v732_v37  ;;  %v929_v37 = vld [vmem:[#allocation3] sm:$0x7] }
 0x15c   : > { %1382 = vmatprep.mubr.f32.mxu0 %v733_v38 }
 0x15f   : > { %1383 = vmatmul.mubr.f32.gmra.mxu0 %v734_v39 }
 0x160   : > { %1385 = vmatprep.mubr.f32.mxu0 %v735_v40 }
 0x163   : > { %1386 = vmatmul.mubr.f32.gmra.mxu0 %v736_v41 }
 0x164   : > { %1388 = vmatprep.mubr.f32.mxu0 %v737_v42 }
 0x167   : > { %1389 = vmatmul.mubr.f32.gmra.mxu0 %v738_v43 }
 0x168   : > { %1391 = vmatprep.mubr.f32.mxu0 %v739_v44 }
 0x16b   : > { %1392 = vmatmul.mubr.f32.gmra.mxu0 %v740_v45 }
 0x16c   : > { %1394 = vmatprep.mubr.f32.mxu0 %v741_v46 }
 0x16f   : > { %1395 = vmatmul.mubr.f32.gmra.mxu0 %v742_v47 }
 0x170   : > { %1397 = vmatprep.mubr.f32.mxu0 %v743_v48 }
 0x173   : > { %1398 = vmatmul.mubr.f32.gmra.mxu0 %v744_v49 }
 0x217   : > { %v1870_v51 = vpop.f32.mrf.mxu0 }
 0x218   : > { %v840_v30 = vadd.f32 %v1870_v51, %v1223_v1 }
 0x219   : > { %v1872_v52 = vpop.f32.mrf.mxu0 }
 0x21a   : > { %v835_v32 = vadd.f32 %v1223_v1, %v1872_v52  ;;  %v914_v34 = vmax.f32 %v840_v30, 0.0 }
 0x21b   : > { %v1381_v53 = vpop.f32.mrf.mxu0 }
 0x21c   : > { %v850_v26 = vadd.f32 %v1381_v53, %v1223_v1  ;;  %v913_v35 = vmax.f32 %v835_v32, 0.0 }
 0x21d   : > { %v844_v54 = vpop.f32.mrf.mxu0 }
 0x21e   : > { %v845_v28 = vadd.f32 %v1223_v1, %v844_v54  ;;  %v916_v31 = vmax.f32 %v850_v26, 0.0 }
 0x21f   : > { %v1384_v55 = vpop.f32.mrf.mxu0 }
 0x220   : > { %v860_v22 = vadd.f32 %v1384_v55, %v1223_v1  ;;  %v915_v33 = vmax.f32 %v845_v28, 0.0 }
 0x221   : > { %v854_v56 = vpop.f32.mrf.mxu0 }
 0x222   : > { %v855_v24 = vadd.f32 %v1223_v1, %v854_v56  ;;  %v918_v27 = vmax.f32 %v860_v22, 0.0 }
 0x223   : > { %v1387_v57 = vpop.f32.mrf.mxu0 }
 0x224   : > { %v870_v18 = vadd.f32 %v1387_v57, %v1223_v1  ;;  %v917_v29 = vmax.f32 %v855_v24, 0.0 }
 0x225   : > { %v864_v58 = vpop.f32.mrf.mxu0 }
 0x226   : > { %v865_v20 = vadd.f32 %v1223_v1, %v864_v58  ;;  %v920_v23 = vmax.f32 %v870_v18, 0.0 }
 0x227   : > { %v1390_v59 = vpop.f32.mrf.mxu0 }
 0x228   : > { %v880_v14 = vadd.f32 %v1390_v59, %v1223_v1  ;;  %v919_v25 = vmax.f32 %v865_v20, 0.0 }
 0x229   : > { %v874_v60 = vpop.f32.mrf.mxu0 }
 0x22a   : > { %v875_v16 = vadd.f32 %v1223_v1, %v874_v60  ;;  %v922_v19 = vmax.f32 %v880_v14, 0.0 }
 0x22b   : > { %v1393_v61 = vpop.f32.mrf.mxu0 }
 0x22c   : > { %v890_v10 = vadd.f32 %v1393_v61, %v1223_v1  ;;  %v921_v21 = vmax.f32 %v875_v16, 0.0 }
 0x22d   : > { %v884_v62 = vpop.f32.mrf.mxu0 }
 0x22e   : > { %v885_v12 = vadd.f32 %v1223_v1, %v884_v62  ;;  %v924_v15 = vmax.f32 %v890_v10, 0.0 }
 0x22f   : > { %v1396_v63 = vpop.f32.mrf.mxu0 }
 0x230   : > { %v900_v5 = vadd.f32 %v1396_v63, %v1223_v1  ;;  %v923_v17 = vmax.f32 %v885_v12, 0.0 }
 0x231   : > { %v894_v0 = vpop.f32.mrf.mxu0 }
 0x232   : > { %v895_v8 = vadd.f32 %v1223_v1, %v894_v0  ;;  %v926_v11 = vmax.f32 %v900_v5, 0.0 }
 0x233   : > { %v1399_v2 = vpop.f32.mrf.mxu0 }
 0x234   : > { %v910_v3 = vadd.f32 %v1399_v2, %v1223_v1  ;;  %v925_v13 = vmax.f32 %v895_v8, 0.0 }
 0x235   : > { %v904_v4 = vpop.f32.mrf.mxu0 }
 0x236   : > { %v928_v6 = vmax.f32 %v910_v3, 0.0  ;;  %v905_v7 = vadd.f32 %v1223_v1, %v904_v4 }
 0x238   : > { %v927_v9 = vmax.f32 %v905_v7, 0.0  ;;  %1401 = vmatpush3.msra.mxu1 %v928_v6 }
 0x239   : > { %1402 = vmatprep.subr.mxu1 %v1657_v50 }
 0x23a   : > { %1403 = vmatpush3.msra.mxu1 %v927_v9 }
 0x23b   : > { %1404 = vmatprep.subr.mxu1 %v1657_v50 }
 0x23c   : > { %1405 = vmatpush3.msra.mxu1 %v926_v11 }
 0x23d   : > { %1406 = vmatprep.subr.mxu1 %v1657_v50 }
 0x23e   : > { %1407 = vmatpush3.msra.mxu1 %v925_v13 }
 0x23f   : > { %1408 = vmatprep.subr.mxu1 %v1657_v50 }
 0x240   : > { %1409 = vmatpush3.msra.mxu1 %v924_v15 }
 0x241   : > { %1410 = vmatprep.subr.mxu1 %v1657_v50 }
 0x242   : > { %1411 = vmatpush3.msra.mxu1 %v923_v17 }
 0x243   : > { %1412 = vmatprep.subr.mxu1 %v1657_v50 }
 0x244   : > { %1413 = vmatpush3.msra.mxu1 %v922_v19 }
 0x245   : > { %1414 = vmatprep.subr.mxu1 %v1657_v50 }
 0x246   : > { %1415 = vmatpush3.msra.mxu1 %v921_v21 }
 0x247   : > { %1416 = vmatprep.subr.mxu1 %v1657_v50 }
 0x248   : > { %1417 = vmatpush3.msra.mxu1 %v920_v23 }
 0x249   : > { %1418 = vmatprep.subr.mxu1 %v1657_v50 }
 0x24a   : > { %1419 = vmatpush3.msra.mxu1 %v919_v25 }
 0x24b   : > { %1420 = vmatprep.subr.mxu1 %v1657_v50 }
 0x24c   : > { %1421 = vmatpush3.msra.mxu1 %v918_v27 }
 0x24d   : > { %1422 = vmatprep.subr.mxu1 %v1657_v50 }
 0x24e   : > { %1423 = vmatpush3.msra.mxu1 %v917_v29 }
 0x24f   : > { %1424 = vmatprep.subr.mxu1 %v1657_v50 }
 0x250   : > { %1425 = vmatpush3.msra.mxu1 %v916_v31 }
 0x251   : > { %1426 = vmatprep.subr.mxu1 %v1657_v50 }
 0x252   : > { %1427 = vmatpush3.msra.mxu1 %v915_v33 }
 0x253   : > { %1428 = vmatprep.subr.mxu1 %v1657_v50 }
 0x254   : > { %1429 = vmatpush3.msra.mxu1 %v914_v34 }
 0x255   : > { %1430 = vmatprep.subr.mxu1 %v1657_v50 }
 0x256   : > { %1431 = vmatpush3.msra.mxu1 %v913_v35 }
 0x257   : > { %1433 = vmatmul.mubr.f32.vlgmr.msra.gmra.mxu1 %v930_v36 }
 0x317   : > { %v997_v38 = vpop.f32.mrf.mxu1 }
 0x318   : > { %v1001_v39 = vadd.f32 %v997_v38, %v929_v37 }
 0x319   : > { %v1434_v40 = vpop.f32.mrf.mxu1 }
 0x31a   : > { %1002 = vst [vmem:[#allocation3] sm:$0x7] %v1001_v39 }
 0x31b PF: > { %p1003_p4 = scmp.eq.s32.totalorder %s1641_s27, 1 }
 0x31d   : > { %p1004_p5 = pnand %p1003_p4, %p725_p2 }
 0x31f   : > { %1007 = sbr.rel (%p1004_p5) target bundleno = 1033 (0x409), region = 105 }
 0x324   : > { %v1024_v41 = vld [vmem:[%s1992_s5 + $0x78] sm:$0xff]  ;;  %v1659_v42 = vmov 0.0   ;;  %v1023_v43 = vld [vmem:[%s1992_s5 + $0x70] sm:$0xff]  ;;  %vm1660_vm1 = vmmov 0   ;;  %v1022_v44 = vld [vmem:[%s1992_s5 + $0x68] sm:$0xff] }
 0x325   : > { %1435 = vmatprep.subr.mxu0 %v1659_v42  ;;  %1467 = vmatprep.mubr.msk.f32.mxu0 %vm1660_vm1, %v1659_v42  ;;  %v1021_v45 = vld [vmem:[%s1992_s5 + $0x60] sm:$0xff]  ;;  %v1020_v46 = vld [vmem:[%s1992_s5 + $0x58] sm:$0xff]  ;;  %v1019_v47 = vld [vmem:[%s1992_s5 + $0x50] sm:$0xff] }
 0x326   : > { %1436 = vmatpush3.msra.mxu0 %v1024_v41  ;;  %v1018_v48 = vld [vmem:[%s1992_s5 + $0x48] sm:$0xff]  ;;  %v1017_v49 = vld [vmem:[%s1992_s5 + $0x40] sm:$0xff]  ;;  %v1016_v50 = vld [vmem:[%s1992_s5 + $0x38] sm:$0xff] }
 0x327   : > { %1437 = vmatprep.subr.mxu0 %v1659_v42  ;;  %v1015_v51 = vld [vmem:[%s1992_s5 + $0x30] sm:$0xff]  ;;  %v1014_v52 = vld [vmem:[%s1992_s5 + $0x28] sm:$0xff]  ;;  %v1013_v53 = vld [vmem:[%s1992_s5 + $0x20] sm:$0xff] }
 0x328   : > { %1438 = vmatpush3.msra.mxu0 %v1023_v43  ;;  %v1012_v54 = vld [vmem:[%s1992_s5 + $0x18] sm:$0xff]  ;;  %v1011_v55 = vld [vmem:[%s1992_s5 + $0x10] sm:$0xff]  ;;  %v1010_v56 = vld [vmem:[%s1992_s5 + $0x8] sm:$0xff] }
 0x329   : > { %1439 = vmatprep.subr.mxu0 %v1659_v42  ;;  %v1009_v57 = vld [vmem:[%s1992_s5] sm:$0xff] }
 0x32a   : > { %1440 = vmatpush3.msra.mxu0 %v1022_v44  ;;  %v1008_v58 = vld [vmem:[#allocation3] sm:$0x7] }
 0x32b   : > { %1441 = vmatprep.subr.mxu0 %v1659_v42  ;;  %v1224_v59 = vld [vmem:[%s1993_s6] ss:$0 sm:$0xff] }
 0x32c   : > { %1442 = vmatpush3.msra.mxu0 %v1021_v45 }
 0x32d   : > { %1443 = vmatprep.subr.mxu0 %v1659_v42 }
 0x32e   : > { %1444 = vmatpush3.msra.mxu0 %v1020_v46 }
 0x32f   : > { %1445 = vmatprep.subr.mxu0 %v1659_v42 }
 0x330   : > { %1446 = vmatpush3.msra.mxu0 %v1019_v47 }
 0x331   : > { %1447 = vmatprep.subr.mxu0 %v1659_v42 }
 0x332   : > { %1448 = vmatpush3.msra.mxu0 %v1018_v48 }
 0x333   : > { %1449 = vmatprep.subr.mxu0 %v1659_v42 }
 0x334   : > { %1450 = vmatpush3.msra.mxu0 %v1017_v49 }
 0x335   : > { %1451 = vmatprep.subr.mxu0 %v1659_v42 }
 0x336   : > { %1452 = vmatpush3.msra.mxu0 %v1016_v50 }
 0x337   : > { %1453 = vmatprep.subr.mxu0 %v1659_v42 }
 0x338   : > { %1454 = vmatpush3.msra.mxu0 %v1015_v51 }
 0x339   : > { %1455 = vmatprep.subr.mxu0 %v1659_v42 }
 0x33a   : > { %1456 = vmatpush3.msra.mxu0 %v1014_v52 }
 0x33b   : > { %1457 = vmatprep.subr.mxu0 %v1659_v42 }
 0x33c   : > { %1458 = vmatpush3.msra.mxu0 %v1013_v53 }
 0x33d   : > { %1459 = vmatprep.subr.mxu0 %v1659_v42 }
 0x33e   : > { %1460 = vmatpush3.msra.mxu0 %v1012_v54 }
 0x33f   : > { %1461 = vmatprep.subr.mxu0 %v1659_v42 }
 0x340   : > { %1462 = vmatpush3.msra.mxu0 %v1011_v55 }
 0x341   : > { %1463 = vmatprep.subr.mxu0 %v1659_v42 }
 0x342   : > { %1464 = vmatpush3.msra.mxu0 %v1010_v56 }
 0x343   : > { %1465 = vmatprep.subr.mxu0 %v1659_v42 }
 0x344   : > { %1466 = vmatpush3.msra.mxu0 %v1009_v57 }
 0x345   : > { %1468 = vmatmul.mubr.f32.vlgmr.msra.gmra.mxu0 %v1008_v58 }
 0x405   : > { %v1098_v60 = vpop.f32.mrf.mxu0 }
 0x406   : > { %v1099_v61 = vadd.f32 %v1224_v59, %v1098_v60 }
 0x407   : > { %v1469_v62 = vpop.f32.mrf.mxu0 }
 0x408   : > { %1102 = vst [vmem:[#allocation5] sm:$0x7] %v1099_v61 }
 0x409 PF: > { %p1951_p6 = scmp.eq.s32.totalorder %s1193_s8, 3  ;;  %s1661_s14 = smov [#allocation5]  }
 0x40a   : > { %s1110_s26 = sshll.u32 %s1661_s14, 4  ;;  %s1111_s26 = int_to_ptr.vmem [resolvable:$true] %s1110_s26 }
 0x40b   : > { %s1571_s27 = scalar_lea.vmem %s1111_s26, 64  ;;  %p1578_p10 = scmp.lt.s32.totalorder %s1111_s26, %s1111_s26 }
 0x40c   : > { %p1572_p7 = scmp.ne.s32.totalorder %s1111_s26, %s1571_s27  ;;  %p1579_p11 = scmp.lt.s32.totalorder %s1571_s27, %s1571_s27 }
 0x40e   : > { %p1573_p8 = pnand %p1572_p7, %p1951_p6  ;;  %p1580_p12 = por %p1579_p11, %p1578_p10 }
 0x410   : > { %p1574_p9 = pneg %p1573_p8 }
 0x412   : > { %p1581_p13 = pnand %p1580_p12, %p1574_p9 }
 0x414   : > { %1584 = shalt.err (!%p1581_p13)
}
 0x415   : > { %1487 = dma.vmem_to_hbm [thread:$0]  (%p1951_p6), %s1111_s26, 64, %s1994_s7, [#allocation6]  }
 0x416   : > { %1624 = dma.done.wait (%p1951_p6), [#allocation6], 64  }
 0x417   : > { %1626 = vsyncadd (%p1951_p6), [#allocation6], 4294967232 }
 0x418 PF: > { %s18_s30 = sadd.s32 1, %s1653_s30   ;;  %s1996_s24 = smov %s1633_s25 }
 0x419   : > { %p15_p0 = scmp.ge.s32.totalorder %s18_s30, 6   ;;  %s1997_s25 = smov %s1754_s15 }
 0x41a   : > { %s1998_s26 = smov %s1645_s28  ;;  %s1999_s27 = smov %s1649_s29 }
 0x41b   : > { %s2000_s28 = smov %s2003_s9  ;;  %s2001_s29 = smov %s2007_s10 }
 0x41c   :  { %17 = sbr.rel (!%p15_p0) target bundleno = 4 (0x4), region = 143 }
 0x421   :  { %1123 = vsyncpa [#allocation6], 1 }
 0x422   :  { %1125 = vsyncpa [#allocation6 + $0x1], 1 }

</bundles_post_ra>
